<compile_context>
chip_gen: v6e
topology: v6e:2x2x1
jax: 0.10.0
libtpu: 0.0.40
codegen_flags: <defaults>
</compile_context>

<pallas_src>
import functools
import math

import numpy as np
import jax
import jax.numpy as jnp
from jax.experimental import pallas as pl
from jax.experimental.pallas import tpu as pltpu


# ----------------------------------------------------------------------------
# Kernel 1: four fused BasisHyperLayers.  grid = (n_proj, num_col_tiles).
# ----------------------------------------------------------------------------
def _hyper_kernel(z_ref, w1_ref, b1_ref, wcb_ref, bcb_ref, bases_ref,
                  w_out_ref, bias_out_ref, coeffs_scr):
    @pl.when(pl.program_id(1) == 0)
    def _():
        # h = relu(z @ W1 + b1)            (B, hidden), f32 accumulation / epilogue
        h = jnp.dot(z_ref[...], w1_ref[0], preferred_element_type=jnp.float32)
        h = jnp.maximum(h + b1_ref[0], 0.0)
        # Fused heads: y = h @ [Wc | Wb] + [bc | bb]      (B, M + E)
        y = jnp.dot(h.astype(wcb_ref.dtype), wcb_ref[0],
                    preferred_element_type=jnp.float32) + bcb_ref[0]
        m = coeffs_scr.shape[1]
        coeffs_scr[...] = y[:, :m].astype(coeffs_scr.dtype)   # coefficients -> VMEM
        bias_out_ref[0] = y[:, m:]                            # hyper bias (f32)

    # W tile = coeffs @ bases_flat[:, col_tile]    (B, TN), lane-dense output
    w_out_ref[0] = jnp.dot(coeffs_scr[...], bases_ref[0],
                           preferred_element_type=jnp.float32
                           ).astype(w_out_ref.dtype)


# ----------------------------------------------------------------------------
# Kernel 2: batch-blocked fused QKV projection + multi-head attention + out proj.
# ----------------------------------------------------------------------------
def _attn_kernel(x_ref, w_ref, b_ref, o_ref, *, num_heads, scale, nb, approx_recip):
    f32 = jnp.float32
    cdt = x_ref.dtype                     # MXU operand dtype (bf16 by default)
    _, T, E = x_ref.shape
    H = num_heads
    hd = E // H

    for i in range(nb):                   # nb is small and static
        x_b = x_ref[i]                     # (T, E)   operand dtype
        w_i = w_ref[i]                     # (E, 4E)  [Wq|Wk|Wv|Wo], operand dtype
        w_qkv = w_i[:, :3 * E]             # (E, 3E)
        w_o = w_i[:, 3 * E:]               # (E, E)

        # Fused QKV projection: one wide MXU matmul, f32 accumulation.
        qkv = jnp.dot(x_b, w_qkv, preferred_element_type=f32)     # (T, 3E)
        q = (qkv[:, :E] + b_ref[0, i]) * scale
        k = qkv[:, E:2 * E] + b_ref[1, i]
        v = qkv[:, 2 * E:] + b_ref[2, i]

        # Heads as a batch dimension: no per-head lane slicing / concat.
        def heads(t):                      # (T, E) f32 -> (H, T, hd), operand dtype
            t = jnp.transpose(t.reshape(T, H, hd), (1, 0, 2))
            return t.astype(cdt)

        qh, kh, vh = heads(q), heads(k), heads(v)

        # scores / softmax / context with bf16 MXU operands, f32 accumulation.
        s = jnp.einsum('htd,hsd->hts', qh, kh, preferred_element_type=f32)
        s = s - jnp.max(s, axis=-1, keepdims=True)
        p = jnp.exp(s)
        denom = jnp.sum(p, axis=-1, keepdims=True)
        if approx_recip:
            p = p * pl.reciprocal(denom, approx=True)    # EUP slot, frees the VALU
        else:
            p = p / denom
        ctx = jnp.einsum('hts,hsd->htd', p.astype(cdt), vh,
                         preferred_element_type=f32)     # (H, T, hd) f32

        attn = jnp.transpose(ctx, (1, 0, 2)).reshape(T, E).astype(cdt)
        out = jnp.dot(attn, w_o, preferred_element_type=f32) + b_ref[3, i]
        o_ref[i] = out.astype(o_ref.dtype)


# ----------------------------------------------------------------------------
# Wrapper helpers
# ----------------------------------------------------------------------------
def _pack_params(params):
    order = ("q", "k", "v", "o")
    w1 = jnp.stack([params[p]["w1"] for p in order])                        # (4, G, H)
    b1 = jnp.stack([params[p]["b1"] for p in order])[:, None, :]            # (4, 1, H)
    wcb = jnp.stack([jnp.concatenate([params[p]["wc"], params[p]["wb"]], axis=1)
                     for p in order])                                       # (4, H, M+E)
    bcb = jnp.stack([jnp.concatenate([params[p]["bc"], params[p]["bb"]])
                     for p in order])[:, None, :]                           # (4, 1, M+E)
    bases = jnp.stack([params[p]["bases"].reshape(params[p]["bases"].shape[0], -1)
                       for p in order])                                     # (4, M, E*E)
    return w1, b1, wcb, bcb, bases


def _vmem_capacity_bytes():
    try:
        info = pltpu.get_tpu_info()
        return int(getattr(info, "vmem_capacity_bytes", 64 << 20))
    except Exception:
        return 64 << 20          # conservative (v7x-sized) fallback


def _pick_col_tile(EE, M, B, itemsize, vmem_bytes, cap):
    """Largest power-of-two (>=128) column tile whose double-buffered bases + W
    output tile fit comfortably in scoped VMEM on this TPU generation."""
    budget = max(vmem_bytes // 4, 1 << 20)
    per_col = 2 * (M + B) * itemsize                 # double-buffered bytes per column
    tn = min(budget // max(per_col, 1), cap)
    if tn >= EE:
        return EE
    tn = max(128, 1 << int(math.log2(max(tn, 1))))
    return min(tn, EE)


def _pick_batch_block(B, E, T, itemsize, vmem_bytes):
    """Batches per grid step in kernel 2: amortize per-step overhead while keeping
    >= 2 grid steps (both TCs busy on v7x) and staying inside VMEM."""
    budget = max(vmem_bytes // 4, 1 << 20)
    per_b = 2 * (4 * E * E * itemsize + T * E * itemsize + T * E * 4 + 4 * E * 4)
    nb = max(1, min(B, 8, budget // max(per_b, 1)))
    if B >= 2:
        nb = max(1, min(nb, B // 2))
    while B % nb:
        nb -= 1
    return nb


def scalable_self_attention(x, z, params, *, num_heads,
                            operand_dtype=jnp.bfloat16, max_col_tile=32768):
    """Pallas implementation of ScalableSelfAttention.forward.

    x: (B, T, E) float32, z: (B, genome_dim) float32 -> out (B, T, E) float32.
    """
    B, T, E = x.shape
    G = z.shape[1]
    w1, b1, wcb, bcb, bases_flat = _pack_params(params)
    n_proj, _, hid = w1.shape
    M = bases_flat.shape[1]
    EE = E * E
    cdt = np.dtype(operand_dtype)
    itm = cdt.itemsize
    vmem_bytes = _vmem_capacity_bytes()

    # ---- Kernel 1: hypernetwork (all 4 projections) ----
    tn = _pick_col_tile(EE, M, B, itm, vmem_bytes, max_col_tile)
    nc = pl.cdiv(EE, tn)
    vmem_limit1 = int(min(vmem_bytes,
                          max(32 << 20, 4 * (M + B) * itm * tn + (8 << 20))))

    w_flat, bias_all = pl.pallas_call(
        _hyper_kernel,
        grid=(n_proj, nc),
        in_specs=[
            pl.BlockSpec((B, G), lambda p, c: (0, 0)),
            pl.BlockSpec((1, G, hid), lambda p, c: (p, 0, 0)),
            pl.BlockSpec((1, 1, hid), lambda p, c: (p, 0, 0)),
            pl.BlockSpec((1, hid, M + E), lambda p, c: (p, 0, 0)),
            pl.BlockSpec((1, 1, M + E), lambda p, c: (p, 0, 0)),
            pl.BlockSpec((1, M, tn), lambda p, c: (p, 0, c)),
        ],
        out_specs=(
            pl.BlockSpec((1, B, tn), lambda p, c: (p, 0, c)),
            pl.BlockSpec((1, B, E), lambda p, c: (p, 0, 0)),
        ),
        out_shape=(
            jax.ShapeDtypeStruct((n_proj, B, EE), cdt),          # flattened W per proj
            jax.ShapeDtypeStruct((n_proj, B, E), jnp.float32),   # hyper biases
        ),
        scratch_shapes=[pltpu.VMEM((B, M), cdt)],
        compiler_params=pltpu.CompilerParams(
            dimension_semantics=("parallel", "arbitrary"),
            vmem_limit_bytes=vmem_limit1),
    )(z.astype(cdt), w1.astype(cdt), b1, wcb.astype(cdt), bcb,
      bases_flat.astype(cdt))

    # Repack W for the attention kernel: (B, E, 4E) with columns [Wq|Wk|Wv|Wo] so the
    # QKV projection is one wide matmul.  (Single XLA layout copy in bf16.)
    w_cat = jnp.transpose(w_flat.reshape(n_proj, B, E, E),
                          (1, 2, 0, 3)).reshape(B, E, n_proj * E)
    bias4 = bias_all.reshape(n_proj, B, 1, E)          # no transpose; read directly

    # ---- Kernel 2: batch-blocked fused projections + multi-head attention ----
    nb = _pick_batch_block(B, E, T, itm, vmem_bytes)
    vmem_limit2 = int(min(vmem_bytes,
                          max(32 << 20,
                              2 * nb * (4 * E * E * itm + 2 * T * E * 4) + (8 << 20))))
    hd = E // num_heads
    scale = 1.0 / float(hd) ** 0.5
    approx = cdt != np.dtype(np.float32)

    out = pl.pallas_call(
        functools.partial(_attn_kernel, num_heads=num_heads, scale=scale,
                          nb=nb, approx_recip=approx),
        grid=(B // nb,),
        in_specs=[
            pl.BlockSpec((nb, T, E), lambda b: (b, 0, 0)),
            pl.BlockSpec((nb, E, n_proj * E), lambda b: (b, 0, 0)),
            pl.BlockSpec((n_proj, nb, 1, E), lambda b: (0, b, 0, 0)),
        ],
        out_specs=pl.BlockSpec((nb, T, E), lambda b: (b, 0, 0)),
        out_shape=jax.ShapeDtypeStruct((B, T, E), jnp.float32),
        compiler_params=pltpu.CompilerParams(
            dimension_semantics=("parallel",),
            vmem_limit_bytes=vmem_limit2),
    )(x.astype(cdt), w_cat, bias4)

    return out


# ----------------------------------------------------------------------------
# Parameter init (Linear weights pre-transposed to (in, out)) and JAX reference.
# ----------------------------------------------------------------------------
def init_params(key, genome_dim, hidden_dim, embed_dim, M):
    def one(k):
        ks = jax.random.split(k, 7)
        return dict(
            w1=jax.random.normal(ks[0], (genome_dim, hidden_dim), jnp.float32) * 0.1,
            b1=jax.random.normal(ks[1], (hidden_dim,), jnp.float32) * 0.1,
            wc=jax.random.normal(ks[2], (hidden_dim, M), jnp.float32) * 0.1,
            bc=jax.random.normal(ks[3], (M,), jnp.float32) * 0.1,
            wb=jax.random.normal(ks[4], (hidden_dim, embed_dim), jnp.float32) * 0.1,
            bb=jax.random.normal(ks[5], (embed_dim,), jnp.float32) * 0.1,
            bases=jax.random.normal(ks[6], (M, embed_dim, embed_dim), jnp.float32) * 0.02,
        )
    kq, kk, kv, ko = jax.random.split(key, 4)
    return dict(q=one(kq), k=one(kk), v=one(kv), o=one(ko))


def _hyper_ref(z, p):
    h = jnp.maximum(z @ p["w1"] + p["b1"], 0.0)
    coeffs = h @ p["wc"] + p["bc"]
    bias = h @ p["wb"] + p["bb"]
    W = jnp.einsum("bm,moi->boi", coeffs, p["bases"])
    return W, bias


def reference(x, z, params, *, num_heads):
    B, T, E = x.shape
    hd = E // num_heads
    Wq, bq = _hyper_ref(z, params["q"])
    Wk, bk = _hyper_ref(z, params["k"])
    Wv, bv = _hyper_ref(z, params["v"])
    Wo, bo = _hyper_ref(z, params["o"])
    Q = jnp.einsum("bei,bte->bti", Wq, x) + bq[:, None, :]
    K = jnp.einsum("bei,bte->bti", Wk, x) + bk[:, None, :]
    V = jnp.einsum("bei,bte->bti", Wv, x) + bv[:, None, :]
    Qh = Q.reshape(B, T, num_heads, hd).transpose(0, 2, 1, 3)
    Kh = K.reshape(B, T, num_heads, hd).transpose(0, 2, 1, 3)
    Vh = V.reshape(B, T, num_heads, hd).transpose(0, 2, 1, 3)
    scores = (Qh @ Kh.transpose(0, 1, 3, 2)) / (hd ** 0.5)
    weights = jax.nn.softmax(scores, axis=-1)
    out_h = weights @ Vh
    out = out_h.transpose(0, 2, 1, 3).reshape(B, T, E)
    return jnp.einsum("bei,bte->bti", Wo, out) + bo[:, None, :]


if __name__ == "__main__":
    B, T, E = 2, 8, 64
    NUM_HEADS = 4
    GENOME_DIM, HIDDEN_DIM, M = 16, 32, 32

    key = jax.random.PRNGKey(0)
    kx, kz, kp = jax.random.split(key, 3)
    x = jax.random.normal(kx, (B, T, E), jnp.float32)
    z = jax.random.normal(kz, (B, GENOME_DIM), jnp.float32)
    params = init_params(kp, GENOME_DIM, HIDDEN_DIM, E, M)

    with jax.default_matmul_precision("highest"):
        out_ref = reference(x, z, params, num_heads=NUM_HEADS)

    # Full-f32 operand path (exact softmax divide): tight correctness check.
    fn_f32 = jax.jit(functools.partial(scalable_self_attention,
                                       num_heads=NUM_HEADS,
                                       operand_dtype=jnp.float32))
    out_f32 = fn_f32(x, z, params)
    jax.block_until_ready(out_f32)
    assert out_f32.shape == (B, T, E)
    assert jnp.allclose(out_f32, out_ref, atol=5e-3, rtol=5e-3), \
        float(jnp.max(jnp.abs(out_f32 - out_ref)))

    # bf16 MXU operands + f32 accumulation (default, fast path): loose check.
    fn_bf16 = jax.jit(functools.partial(scalable_self_attention,
                                        num_heads=NUM_HEADS,
                                        operand_dtype=jnp.bfloat16))
    out_bf16 = fn_bf16(x, z, params)
    jax.block_until_ready(out_bf16)
    assert out_bf16.shape == (B, T, E)
    assert jnp.allclose(out_bf16, out_ref, atol=5e-2, rtol=5e-2), \
        float(jnp.max(jnp.abs(out_bf16 - out_ref)))

    print("KERNEL_OK")
</pallas_src>

<mosaic_0001>
module attributes {stable_mosaic.version = 11 : i64} {
  func.func @_hyper_kernel(%arg0: i32, %arg1: i32, %arg2: memref<2x16xf32, #tpu.memory_space<vmem>>, %arg3: memref<1x16x32xf32, #tpu.memory_space<vmem>>, %arg4: memref<1x1x32xf32, #tpu.memory_space<vmem>>, %arg5: memref<1x32x96xf32, #tpu.memory_space<vmem>>, %arg6: memref<1x1x96xf32, #tpu.memory_space<vmem>>, %arg7: memref<1x32x4096xf32, #tpu.memory_space<vmem>>, %arg8: memref<1x2x4096xf32, #tpu.memory_space<vmem>>, %arg9: memref<1x2x64xf32, #tpu.memory_space<vmem>>, %arg10: memref<2x32xf32, #tpu.memory_space<vmem>>) attributes {dimension_semantics = [#tpu.dimension_semantics<parallel>, #tpu.dimension_semantics<arbitrary>], iteration_bounds = array<i64: 4, 1>, scalar_prefetch = 0 : i64, scratch_operands = 1 : i64, tpu.core_type = #tpu.core_type<tc>, window_params = [{pipeline_mode = #tpu.pipeline_mode<synchronous>, transform_indices = @transform_0, window_bounds = array<i64: 2, 16>}, {transform_indices = @transform_1, window_bounds = array<i64: 1, 16, 32>}, {transform_indices = @transform_2, window_bounds = array<i64: 1, 1, 32>}, {transform_indices = @transform_3, window_bounds = array<i64: 1, 32, 96>}, {transform_indices = @transform_4, window_bounds = array<i64: 1, 1, 96>}, {transform_indices = @transform_5, window_bounds = array<i64: 1, 32, 4096>}, {transform_indices = @transform_6, window_bounds = array<i64: 1, 2, 4096>}, {transform_indices = @transform_7, window_bounds = array<i64: 1, 2, 64>}]} {
    %c0_i32 = arith.constant 0 : i32
    %0 = arith.cmpi eq, %arg1, %c0_i32 : i32
    %1 = arith.extui %0 : i1 to i32
    %c0_i32_0 = arith.constant 0 : i32
    %2 = arith.cmpi ne, %1, %c0_i32_0 : i32
    scf.if %2 {
      %c0_8 = arith.constant 0 : index
      %c0_9 = arith.constant 0 : index
      %10 = vector.load %arg2[%c0_8, %c0_9] : memref<2x16xf32, #tpu.memory_space<vmem>>, vector<2x16xf32>
      %c0_10 = arith.constant 0 : index
      %c0_11 = arith.constant 0 : index
      %c0_12 = arith.constant 0 : index
      %11 = vector.load %arg3[%c0_10, %c0_11, %c0_12] : memref<1x16x32xf32, #tpu.memory_space<vmem>>, vector<1x16x32xf32>
      %12 = vector.shape_cast %11 : vector<1x16x32xf32> to vector<16x32xf32>
      %cst_13 = arith.constant dense<0.000000e+00> : vector<2x32xf32>
      %13 = tpu.matmul %10, %12, %cst_13 {dimension_numbers = #tpu.dot_dimension_numbers<[1], [0], [0], [1], [0, 0, 1, 1], [], []>} : vector<2x16xf32>, vector<16x32xf32>, vector<2x32xf32> -> vector<2x32xf32>
      %c0_14 = arith.constant 0 : index
      %c0_15 = arith.constant 0 : index
      %c0_16 = arith.constant 0 : index
      %14 = vector.load %arg4[%c0_14, %c0_15, %c0_16] : memref<1x1x32xf32, #tpu.memory_space<vmem>>, vector<1x1x32xf32>
      %15 = vector.shape_cast %14 : vector<1x1x32xf32> to vector<1x32xf32>
      %16 = vector.broadcast %15 : vector<1x32xf32> to vector<2x32xf32>
      %17 = arith.addf %13, %16 : vector<2x32xf32>
      %cst_17 = arith.constant 0.000000e+00 : f32
      %18 = vector.broadcast %cst_17 : f32 to vector<2x32xf32>
      %19 = arith.maximumf %17, %18 : vector<2x32xf32>
      %c0_18 = arith.constant 0 : index
      %c0_19 = arith.constant 0 : index
      %c0_20 = arith.constant 0 : index
      %20 = vector.load %arg5[%c0_18, %c0_19, %c0_20] : memref<1x32x96xf32, #tpu.memory_space<vmem>>, vector<1x32x96xf32>
      %21 = vector.shape_cast %20 : vector<1x32x96xf32> to vector<32x96xf32>
      %cst_21 = arith.constant dense<0.000000e+00> : vector<2x96xf32>
      %22 = tpu.matmul %19, %21, %cst_21 {dimension_numbers = #tpu.dot_dimension_numbers<[1], [0], [0], [1], [0, 0, 1, 1], [], []>} : vector<2x32xf32>, vector<32x96xf32>, vector<2x96xf32> -> vector<2x96xf32>
      %c0_22 = arith.constant 0 : index
      %c0_23 = arith.constant 0 : index
      %c0_24 = arith.constant 0 : index
      %23 = vector.load %arg6[%c0_22, %c0_23, %c0_24] : memref<1x1x96xf32, #tpu.memory_space<vmem>>, vector<1x1x96xf32>
      %24 = vector.shape_cast %23 : vector<1x1x96xf32> to vector<1x96xf32>
      %25 = vector.broadcast %24 : vector<1x96xf32> to vector<2x96xf32>
      %26 = arith.addf %22, %25 : vector<2x96xf32>
      %27 = vector.extract_strided_slice %26 {offsets = [0, 0], sizes = [2, 32], strides = [1, 1]} : vector<2x96xf32> to vector<2x32xf32>
      %c0_25 = arith.constant 0 : index
      %c0_26 = arith.constant 0 : index
      %28 = vector.load %arg10[%c0_25, %c0_26] : memref<2x32xf32, #tpu.memory_space<vmem>>, vector<2x32xf32>
      tpu.vector_store %arg10[%c0_25, %c0_26], %27 {strides = array<i32>} : memref<2x32xf32, #tpu.memory_space<vmem>>, vector<2x32xf32>,
      %29 = vector.extract_strided_slice %26 {offsets = [0, 32], sizes = [2, 64], strides = [1, 1]} : vector<2x96xf32> to vector<2x64xf32>
      %c0_27 = arith.constant 0 : index
      %c0_28 = arith.constant 0 : index
      %c0_29 = arith.constant 0 : index
      %30 = vector.load %arg9[%c0_27, %c0_28, %c0_29] : memref<1x2x64xf32, #tpu.memory_space<vmem>>, vector<1x2x64xf32>
      %31 = vector.shape_cast %30 : vector<1x2x64xf32> to vector<2x64xf32>
      %32 = vector.shape_cast %29 : vector<2x64xf32> to vector<1x2x64xf32>
      tpu.vector_store %arg9[%c0_27, %c0_28, %c0_29], %32 {strides = array<i32>} : memref<1x2x64xf32, #tpu.memory_space<vmem>>, vector<1x2x64xf32>,
    } else {
    }
    %c0 = arith.constant 0 : index
    %c0_1 = arith.constant 0 : index
    %3 = vector.load %arg10[%c0, %c0_1] : memref<2x32xf32, #tpu.memory_space<vmem>>, vector<2x32xf32>
    %c0_2 = arith.constant 0 : index
    %c0_3 = arith.constant 0 : index
    %c0_4 = arith.constant 0 : index
    %4 = vector.load %arg7[%c0_2, %c0_3, %c0_4] : memref<1x32x4096xf32, #tpu.memory_space<vmem>>, vector<1x32x4096xf32>
    %5 = vector.shape_cast %4 : vector<1x32x4096xf32> to vector<32x4096xf32>
    %cst = arith.constant dense<0.000000e+00> : vector<2x4096xf32>
    %6 = tpu.matmul %3, %5, %cst {dimension_numbers = #tpu.dot_dimension_numbers<[1], [0], [0], [1], [0, 0, 1, 1], [], []>} : vector<2x32xf32>, vector<32x4096xf32>, vector<2x4096xf32> -> vector<2x4096xf32>
    %c0_5 = arith.constant 0 : index
    %c0_6 = arith.constant 0 : index
    %c0_7 = arith.constant 0 : index
    %7 = vector.load %arg8[%c0_5, %c0_6, %c0_7] : memref<1x2x4096xf32, #tpu.memory_space<vmem>>, vector<1x2x4096xf32>
    %8 = vector.shape_cast %7 : vector<1x2x4096xf32> to vector<2x4096xf32>
    %9 = vector.shape_cast %6 : vector<2x4096xf32> to vector<1x2x4096xf32>
    tpu.vector_store %arg8[%c0_5, %c0_6, %c0_7], %9 {strides = array<i32>} : memref<1x2x4096xf32, #tpu.memory_space<vmem>>, vector<1x2x4096xf32>,
    return
  }
  func.func @transform_0(%arg0: i32, %arg1: i32) -> (i32, i32) {
    %c0_i32 = arith.constant 0 : i32
    %c0_i32_0 = arith.constant 0 : i32
    %c0_i32_1 = arith.constant 0 : i32
    return %c0_i32, %c0_i32_0 : i32, i32
  }
  func.func @transform_1(%arg0: i32, %arg1: i32) -> (i32, i32, i32) {
    %c0_i32 = arith.constant 0 : i32
    %c0_i32_0 = arith.constant 0 : i32
    %c0_i32_1 = arith.constant 0 : i32
    return %arg0, %c0_i32, %c0_i32_0 : i32, i32, i32
  }
  func.func @transform_2(%arg0: i32, %arg1: i32) -> (i32, i32, i32) {
    %c0_i32 = arith.constant 0 : i32
    %c0_i32_0 = arith.constant 0 : i32
    %c0_i32_1 = arith.constant 0 : i32
    return %arg0, %c0_i32, %c0_i32_0 : i32, i32, i32
  }
  func.func @transform_3(%arg0: i32, %arg1: i32) -> (i32, i32, i32) {
    %c0_i32 = arith.constant 0 : i32
    %c0_i32_0 = arith.constant 0 : i32
    %c0_i32_1 = arith.constant 0 : i32
    return %arg0, %c0_i32, %c0_i32_0 : i32, i32, i32
  }
  func.func @transform_4(%arg0: i32, %arg1: i32) -> (i32, i32, i32) {
    %c0_i32 = arith.constant 0 : i32
    %c0_i32_0 = arith.constant 0 : i32
    %c0_i32_1 = arith.constant 0 : i32
    return %arg0, %c0_i32, %c0_i32_0 : i32, i32, i32
  }
  func.func @transform_5(%arg0: i32, %arg1: i32) -> (i32, i32, i32) {
    %c0_i32 = arith.constant 0 : i32
    %c0_i32_0 = arith.constant 0 : i32
    return %arg0, %c0_i32, %arg1 : i32, i32, i32
  }
  func.func @transform_6(%arg0: i32, %arg1: i32) -> (i32, i32, i32) {
    %c0_i32 = arith.constant 0 : i32
    %c0_i32_0 = arith.constant 0 : i32
    return %arg0, %c0_i32, %arg1 : i32, i32, i32
  }
  func.func @transform_7(%arg0: i32, %arg1: i32) -> (i32, i32, i32) {
    %c0_i32 = arith.constant 0 : i32
    %c0_i32_0 = arith.constant 0 : i32
    %c0_i32_1 = arith.constant 0 : i32
    return %arg0, %c0_i32, %c0_i32_0 : i32, i32, i32
  }
}

module attributes {stable_mosaic.version = 11 : i64} {
  func.func @_attn_kernel(%arg0: i32, %arg1: memref<1x8x64xf32, #tpu.memory_space<vmem>>, %arg2: memref<1x64x256xf32, #tpu.memory_space<vmem>>, %arg3: memref<4x1x1x64xf32, #tpu.memory_space<vmem>>, %arg4: memref<1x8x64xf32, #tpu.memory_space<vmem>>) attributes {dimension_semantics = [#tpu.dimension_semantics<parallel>], iteration_bounds = array<i64: 2>, scalar_prefetch = 0 : i64, scratch_operands = 0 : i64, tpu.core_type = #tpu.core_type<tc>, window_params = [{transform_indices = @transform_0, window_bounds = array<i64: 1, 8, 64>}, {transform_indices = @transform_1, window_bounds = array<i64: 1, 64, 256>}, {transform_indices = @transform_2, window_bounds = array<i64: 4, 1, 1, 64>}, {transform_indices = @transform_3, window_bounds = array<i64: 1, 8, 64>}]} {
    %c0 = arith.constant 0 : index
    %c0_0 = arith.constant 0 : index
    %c0_1 = arith.constant 0 : index
    %0 = vector.load %arg1[%c0, %c0_0, %c0_1] : memref<1x8x64xf32, #tpu.memory_space<vmem>>, vector<1x8x64xf32>
    %1 = vector.shape_cast %0 : vector<1x8x64xf32> to vector<8x64xf32>
    %c0_2 = arith.constant 0 : index
    %c0_3 = arith.constant 0 : index
    %c0_4 = arith.constant 0 : index
    %2 = vector.load %arg2[%c0_2, %c0_3, %c0_4] : memref<1x64x256xf32, #tpu.memory_space<vmem>>, vector<1x64x256xf32>
    %3 = vector.shape_cast %2 : vector<1x64x256xf32> to vector<64x256xf32>
    %4 = vector.extract_strided_slice %3 {offsets = [0, 0], sizes = [64, 192], strides = [1, 1]} : vector<64x256xf32> to vector<64x192xf32>
    %5 = vector.extract_strided_slice %3 {offsets = [0, 192], sizes = [64, 64], strides = [1, 1]} : vector<64x256xf32> to vector<64x64xf32>
    %cst = arith.constant dense<0.000000e+00> : vector<8x192xf32>
    %6 = tpu.matmul %1, %4, %cst {dimension_numbers = #tpu.dot_dimension_numbers<[1], [0], [0], [1], [0, 0, 1, 1], [], []>} : vector<8x64xf32>, vector<64x192xf32>, vector<8x192xf32> -> vector<8x192xf32>
    %7 = vector.extract_strided_slice %6 {offsets = [0, 0], sizes = [8, 64], strides = [1, 1]} : vector<8x192xf32> to vector<8x64xf32>
    %c0_5 = arith.constant 0 : index
    %c0_6 = arith.constant 0 : index
    %c0_7 = arith.constant 0 : index
    %c0_8 = arith.constant 0 : index
    %8 = vector.load %arg3[%c0_5, %c0_6, %c0_7, %c0_8] : memref<4x1x1x64xf32, #tpu.memory_space<vmem>>, vector<1x1x1x64xf32>
    %9 = vector.shape_cast %8 : vector<1x1x1x64xf32> to vector<1x64xf32>
    %10 = vector.broadcast %9 : vector<1x64xf32> to vector<8x64xf32>
    %11 = arith.addf %7, %10 : vector<8x64xf32>
    %cst_9 = arith.constant 2.500000e-01 : f32
    %12 = vector.broadcast %cst_9 : f32 to vector<8x64xf32>
    %13 = arith.mulf %11, %12 : vector<8x64xf32>
    %14 = vector.extract_strided_slice %6 {offsets = [0, 64], sizes = [8, 64], strides = [1, 1]} : vector<8x192xf32> to vector<8x64xf32>
    %c1 = arith.constant 1 : index
    %c0_10 = arith.constant 0 : index
    %c0_11 = arith.constant 0 : index
    %c0_12 = arith.constant 0 : index
    %15 = vector.load %arg3[%c1, %c0_10, %c0_11, %c0_12] : memref<4x1x1x64xf32, #tpu.memory_space<vmem>>, vector<1x1x1x64xf32>
    %16 = vector.shape_cast %15 : vector<1x1x1x64xf32> to vector<1x64xf32>
    %17 = vector.broadcast %16 : vector<1x64xf32> to vector<8x64xf32>
    %18 = arith.addf %14, %17 : vector<8x64xf32>
    %19 = vector.extract_strided_slice %6 {offsets = [0, 128], sizes = [8, 64], strides = [1, 1]} : vector<8x192xf32> to vector<8x64xf32>
    %c2 = arith.constant 2 : index
    %c0_13 = arith.constant 0 : index
    %c0_14 = arith.constant 0 : index
    %c0_15 = arith.constant 0 : index
    %20 = vector.load %arg3[%c2, %c0_13, %c0_14, %c0_15] : memref<4x1x1x64xf32, #tpu.memory_space<vmem>>, vector<1x1x1x64xf32>
    %21 = vector.shape_cast %20 : vector<1x1x1x64xf32> to vector<1x64xf32>
    %22 = vector.broadcast %21 : vector<1x64xf32> to vector<8x64xf32>
    %23 = arith.addf %19, %22 : vector<8x64xf32>
    %24 = vector.shape_cast %13 : vector<8x64xf32> to vector<8x4x16xf32>
    %25 = tpu.transpose %24, [1, 0, 2] : vector<8x4x16xf32> -> vector<4x8x16xf32>
    %26 = vector.shape_cast %18 : vector<8x64xf32> to vector<8x4x16xf32>
    %27 = tpu.transpose %26, [1, 0, 2] : vector<8x4x16xf32> -> vector<4x8x16xf32>
    %28 = vector.shape_cast %23 : vector<8x64xf32> to vector<8x4x16xf32>
    %29 = tpu.transpose %28, [1, 0, 2] : vector<8x4x16xf32> -> vector<4x8x16xf32>
    "tpu.trace_start"() <{level = 10 : i32, message = "htd,hsd->hts"}> : () -> ()
    %cst_16 = arith.constant dense<0.000000e+00> : vector<4x8x8xf32>
    %30 = tpu.matmul %25, %27, %cst_16 {dimension_numbers = #tpu.dot_dimension_numbers<[2], [2], [1], [1], [0, 0, 0, 1, 1, 1], [0], [0]>} : vector<4x8x16xf32>, vector<4x8x16xf32>, vector<4x8x8xf32> -> vector<4x8x8xf32>
    "tpu.trace_stop"() : () -> ()
    %cst_17 = arith.constant dense<0xFF800000> : vector<4x8xf32>
    %31 = vector.multi_reduction <maximumf>, %30, %cst_17 [2] : vector<4x8x8xf32> to vector<4x8xf32>
    %32 = vector.shape_cast %31 : vector<4x8xf32> to vector<4x8x1xf32>
    %33 = vector.broadcast %32 : vector<4x8x1xf32> to vector<4x8x8xf32>
    %34 = arith.subf %30, %33 : vector<4x8x8xf32>
    %35 = math.exp %34 : vector<4x8x8xf32>
    %cst_18 = arith.constant dense<0.000000e+00> : vector<4x8xf32>
    %36 = vector.multi_reduction <add>, %35, %cst_18 [2] : vector<4x8x8xf32> to vector<4x8xf32>
    %37 = vector.shape_cast %36 : vector<4x8xf32> to vector<4x8x1xf32>
    %38 = vector.broadcast %37 : vector<4x8x1xf32> to vector<4x8x8xf32>
    %39 = arith.divf %35, %38 : vector<4x8x8xf32>
    "tpu.trace_start"() <{level = 10 : i32, message = "hts,hsd->htd"}> : () -> ()
    %cst_19 = arith.constant dense<0.000000e+00> : vector<4x8x16xf32>
    %40 = tpu.matmul %39, %29, %cst_19 {dimension_numbers = #tpu.dot_dimension_numbers<[2], [1], [1], [2], [0, 0, 0, 1, 1, 2], [0], [0]>} : vector<4x8x8xf32>, vector<4x8x16xf32>, vector<4x8x16xf32> -> vector<4x8x16xf32>
    "tpu.trace_stop"() : () -> ()
    %41 = tpu.transpose %40, [1, 0, 2] : vector<4x8x16xf32> -> vector<8x4x16xf32>
    %42 = vector.shape_cast %41 : vector<8x4x16xf32> to vector<8x64xf32>
    %cst_20 = arith.constant dense<0.000000e+00> : vector<8x64xf32>
    %43 = tpu.matmul %42, %5, %cst_20 {dimension_numbers = #tpu.dot_dimension_numbers<[1], [0], [0], [1], [0, 0, 1, 1], [], []>} : vector<8x64xf32>, vector<64x64xf32>, vector<8x64xf32> -> vector<8x64xf32>
    %c3 = arith.constant 3 : index
    %c0_21 = arith.constant 0 : index
    %c0_22 = arith.constant 0 : index
    %c0_23 = arith.constant 0 : index
    %44 = vector.load %arg3[%c3, %c0_21, %c0_22, %c0_23] : memref<4x1x1x64xf32, #tpu.memory_space<vmem>>, vector<1x1x1x64xf32>
    %45 = vector.shape_cast %44 : vector<1x1x1x64xf32> to vector<1x64xf32>
    %46 = vector.broadcast %45 : vector<1x64xf32> to vector<8x64xf32>
    %47 = arith.addf %43, %46 : vector<8x64xf32>
    %c0_24 = arith.constant 0 : index
    %c0_25 = arith.constant 0 : index
    %c0_26 = arith.constant 0 : index
    %48 = vector.load %arg4[%c0_24, %c0_25, %c0_26] : memref<1x8x64xf32, #tpu.memory_space<vmem>>, vector<1x8x64xf32>
    %49 = vector.shape_cast %48 : vector<1x8x64xf32> to vector<8x64xf32>
    %50 = vector.shape_cast %47 : vector<8x64xf32> to vector<1x8x64xf32>
    tpu.vector_store %arg4[%c0_24, %c0_25, %c0_26], %50 {strides = array<i32>} : memref<1x8x64xf32, #tpu.memory_space<vmem>>, vector<1x8x64xf32>,
    return
  }
  func.func @transform_0(%arg0: i32) -> (i32, i32, i32) {
    %c0_i32 = arith.constant 0 : i32
    %c0_i32_0 = arith.constant 0 : i32
    %c0_i32_1 = arith.constant 0 : i32
    return %arg0, %c0_i32, %c0_i32_0 : i32, i32, i32
  }
  func.func @transform_1(%arg0: i32) -> (i32, i32, i32) {
    %c0_i32 = arith.constant 0 : i32
    %c0_i32_0 = arith.constant 0 : i32
    %c0_i32_1 = arith.constant 0 : i32
    return %arg0, %c0_i32, %c0_i32_0 : i32, i32, i32
  }
  func.func @transform_2(%arg0: i32) -> (i32, i32, i32, i32) {
    %c0_i32 = arith.constant 0 : i32
    %c0_i32_0 = arith.constant 0 : i32
    %c0_i32_1 = arith.constant 0 : i32
    %c0_i32_2 = arith.constant 0 : i32
    return %c0_i32, %arg0, %c0_i32_0, %c0_i32_1 : i32, i32, i32, i32
  }
  func.func @transform_3(%arg0: i32) -> (i32, i32, i32) {
    %c0_i32 = arith.constant 0 : i32
    %c0_i32_0 = arith.constant 0 : i32
    %c0_i32_1 = arith.constant 0 : i32
    return %arg0, %c0_i32, %c0_i32_0 : i32, i32, i32
  }
}

</mosaic_0001>

<bundles_post_ra>
// kernel: scalable_self_attention.2
= control target key start
LH: loop header
LB: loop body
LE: loop exit
PB: predicated region body
PF: predicated region fallthrough
CT: control target
= control target key end

     0   :  { %s2354_s24 = smov 0   ;;  %s2356_s25 = smov 0   ;;  %s2631_s0 = inlined_call_operand.vmem [shape: f32[2,16], index: 0, kind: input, shape index: {}]   ;;  %s2632_s1 = inlined_call_operand.vmem [shape: f32[4,16,32], index: 1, kind: input, shape index: {}]   ;;  %s2633_s2 = inlined_call_operand.vmem [shape: f32[4,1,32], index: 2, kind: input, shape index: {}]   ;;  %s2634_s3 = inlined_call_operand.vmem [shape: f32[4,32,96], index: 3, kind: input, shape index: {}]   ;;  %s2635_s4 = inlined_call_operand.vmem [shape: f32[4,1,96], index: 4, kind: input, shape index: {}]   ;;  %s2636_s5 = inlined_call_operand.vmem [shape: f32[4,32,4096], index: 5, kind: input, shape index: {}]   ;;  %s2637_s6 = inlined_call_operand.vmem [shape: f32[4,2,4096], index: 6, kind: output, shape index: {0}]   ;;  %s2638_s7 = inlined_call_operand.vmem [shape: f32[4,2,64], index: 7, kind: output, shape index: {1}]  }
   0x1   :  { %s2358_s26 = smov 0  }
   0x2 LB: > { %s30_s27 = sadd.s32 1, %s2304_s25  ;;  %p2196_p0 = scmp.ge.s32.totalorder %s2308_s26, 1  ;;  %s2308_s26 = sphi %s2358_s26, %s18_s26   ;;  %s2304_s25 = sphi %s2356_s25, %s2640_s25   ;;  %s2300_s24 = sphi %s2354_s24, %s2639_s24  }
   0x3   : > { %p32_p1 = scmp.ge.s32.totalorder %s30_s27, 4  ;;  %p297_p2 = scmp.lt.s32.totalorder %s2308_s26, 5 }
   0x5   : > { %s2642_s27 = smov (%p32_p1, %s30_s27), 0  ;;  %p298_p3 = pnand %p2196_p0, %p297_p2 }
   0x6   : > { %p357_p4 = scmp.lt.s32.totalorder (!%p298_p3), %s2300_s24, 3  ;;  %s2312_s29 = smov (!%p298_p3), 96  }
   0x7   : > { %301 = sbr.rel (%p298_p3) target bundleno = 690 (0x2b2), region = 44 }
   0xc   : > { %v2310_v0 = vmov 0.0   ;;  %vm2311_vm0 = vmmov 0   ;;  %s2644_s24 = smov (!%p357_p4, %s2300_s24), 3  ;;  %v401_v3 = vld [vmem:[%s2631_s0] sm:$0x3]  ;;  %vm411_vm1 = vcmask 130048  }
   0xd   : > { %2240 = vmatprep.subr.mxu0 %v2310_v0  ;;  %2244 = vmatprep.mubr.msk.f32.mxu0 %vm2311_vm0, %v2310_v0  ;;  %s2228_s28 = sshll.u32 %s2644_s24, 4  ;;  %s2229_s9 = sshll.u32 %s2644_s24, 5  ;;  %vm497_vm2 = vcmask 261120   ;;  %vm571_vm3 = vcmask 254976   ;;  %vm577_vm4 = vcmask 517120  }
   0xe   : > { %2247 = vmatprep.subr.mxu1 %v2310_v0  ;;  %2255 = vmatprep.mubr.msk.f32.mxu1 %vm2311_vm0, %v2310_v0  ;;  %s361_s8 = scalar_lea.vmem %s2632_s1, %s2228_s28  ;;  %s369_s14 = scalar_lea.vmem %s2634_s3, %s2229_s9 }
   0xf   : > { %v403_v1 = vld [vmem:[%s361_s8 + $0x8] sm:$0xff]  ;;  %v402_v2 = vld [vmem:[%s361_s8] sm:$0xff]  ;;  %v489_v4 = vld [vmem:[%s369_s14 + $0x18] sm:$0xff]  ;;  %s364_s17 = scalar_lea.vmem %s2633_s2, %s2644_s24  ;;  %s2230_s18 = sshll.u32 %s2644_s24, 10 }
  0x10   : > { %2241 = vmatpush3.msra.mxu0 %v403_v1  ;;  %2248 = vmatpush3.msra.mxu1 %v489_v4  ;;  %v488_v5 = vld [vmem:[%s369_s14 + $0x10] sm:$0xff]  ;;  %v487_v6 = vld [vmem:[%s369_s14 + $0x8] sm:$0xff]  ;;  %v486_v7 = vld [vmem:[%s369_s14] sm:$0xff]  ;;  %s2404_s21 = scalar_lea.vmem %s2636_s5, %s2230_s18  ;;  %s372_s28 = scalar_lea.vmem %s2635_s4, %s2644_s24 }
  0x11   : > { %2242 = vmatprep.subr.mxu0 %v2310_v0  ;;  %2249 = vmatprep.subr.mxu1 %v2310_v0  ;;  %v2206_v8 = vld [vmem:[%s364_s17] ss:$0 sm:$0xff]  ;;  %v677_v13 = vld [vmem:[%s2404_s21 + $0x308] sm:$0xff]  ;;  %v679_v14 = vld [vmem:[%s2404_s21 + $0x318] sm:$0xff]  ;;  %s2205_s30 = sshll.u32 %s2644_s24, 1  ;;  %s2231_s11 = sshll.u32 %s2644_s24, 6 }
  0x12   : > { %2243 = vmatpush3.msra.mxu0 %v402_v2  ;;  %2250 = vmatpush3.msra.mxu1 %v488_v5  ;;  %v676_v15 = vld [vmem:[%s2404_s21 + $0x300] sm:$0xff]  ;;  %v678_v16 = vld [vmem:[%s2404_s21 + $0x310] sm:$0xff]  ;;  %v645_v17 = vld [vmem:[%s2404_s21 + $0x208] sm:$0xff]  ;;  %s396_s10 = scalar_lea.vmem %s2638_s7, %s2205_s30  ;;  %s2598_s14 = scalar_lea.vmem %s2637_s6, %s2231_s11 }
  0x13   : > { %2245 = vmatmul.mubr.msk.f32.vlgmr.msra.gmra.mxu0 %vm411_vm1, %v401_v3  ;;  %2251 = vmatprep.subr.mxu1 %v2310_v0  ;;  %v647_v18 = vld [vmem:[%s2404_s21 + $0x218] sm:$0xff]  ;;  %v644_v19 = vld [vmem:[%s2404_s21 + $0x200] sm:$0xff]  ;;  %v646_v20 = vld [vmem:[%s2404_s21 + $0x210] sm:$0xff] }
  0x14   : > { %776 = vmatprep.mubr.f32.mxu0 %v2310_v0  ;;  %2252 = vmatpush3.msra.mxu1 %v487_v6  ;;  %v613_v21 = vld [vmem:[%s2404_s21 + $0x108] sm:$0xff]  ;;  %v615_v22 = vld [vmem:[%s2404_s21 + $0x118] sm:$0xff]  ;;  %v612_v23 = vld [vmem:[%s2404_s21 + $0x100] sm:$0xff] }
  0x15   : > { %2253 = vmatprep.subr.mxu1 %v2310_v0  ;;  %736 = vmatprep.subr.mxu0 %v677_v13  ;;  %v614_v24 = vld [vmem:[%s2404_s21 + $0x110] sm:$0xff]  ;;  %v581_v25 = vld [vmem:[%s2404_s21 + $0x8] sm:$0xff]  ;;  %v583_v26 = vld [vmem:[%s2404_s21 + $0x18] sm:$0xff] }
  0x16   : > { %2254 = vmatpush3.msra.mxu1 %v486_v7  ;;  %737 = vmatpush1.msra.mxu0 %v676_v15  ;;  %v580_v27 = vld [vmem:[%s2404_s21] sm:$0xff]  ;;  %v582_v28 = vld [vmem:[%s2404_s21 + $0x10] sm:$0xff]  ;;  %v681_v29 = vld [vmem:[%s2404_s21 + $0x328] sm:$0xff] }
  0x17   : > { %807 = vmatprep.subr.mxu1 %v679_v14  ;;  %738 = vmatprep.subr.mxu0 %v645_v17  ;;  %v683_v30 = vld [vmem:[%s2404_s21 + $0x338] sm:$0xff]  ;;  %v2208_v31 = vld [vmem:[%s372_s28] ss:$0 sm:$0xff]  ;;  %v682_v36 = vld [vmem:[%s2404_s21 + $0x330] sm:$0xff] }
  0x18   : > { %739 = vmatpush1.msra.mxu0 %v644_v19  ;;  %v680_v35 = vld [vmem:[%s2404_s21 + $0x320] sm:$0xff]  ;;  %v649_v38 = vld [vmem:[%s2404_s21 + $0x228] sm:$0xff]  ;;  %v651_v39 = vld [vmem:[%s2404_s21 + $0x238] sm:$0xff] }
  0x19   : > { %740 = vmatprep.subr.mxu0 %v613_v21  ;;  %v648_v40 = vld [vmem:[%s2404_s21 + $0x220] sm:$0xff]  ;;  %v650_v41 = vld [vmem:[%s2404_s21 + $0x230] sm:$0xff]  ;;  %v617_v42 = vld [vmem:[%s2404_s21 + $0x128] sm:$0xff] }
  0x1a   : > { %741 = vmatpush1.msra.mxu0 %v612_v23  ;;  %v619_v43 = vld [vmem:[%s2404_s21 + $0x138] sm:$0xff]  ;;  %v616_v44 = vld [vmem:[%s2404_s21 + $0x120] sm:$0xff]  ;;  %v618_v45 = vld [vmem:[%s2404_s21 + $0x130] sm:$0xff] }
  0x1b   : > { %742 = vmatprep.subr.mxu0 %v581_v25  ;;  %v585_v46 = vld [vmem:[%s2404_s21 + $0x28] sm:$0xff]  ;;  %v587_v47 = vld [vmem:[%s2404_s21 + $0x38] sm:$0xff]  ;;  %v584_v48 = vld [vmem:[%s2404_s21 + $0x20] sm:$0xff] }
  0x1c   : > { %743 = vmatpush1.msra.mxu0 %v580_v27  ;;  %v586_v49 = vld [vmem:[%s2404_s21 + $0x30] sm:$0xff]  ;;  %v685_v50 = vld [vmem:[%s2404_s21 + $0x348] sm:$0xff]  ;;  %v687_v51 = vld [vmem:[%s2404_s21 + $0x358] sm:$0xff] }
  0x1d   : > { %878 = vmatprep.subr.mxu0 %v681_v29  ;;  %v684_v52 = vld [vmem:[%s2404_s21 + $0x340] sm:$0xff]  ;;  %v686_v53 = vld [vmem:[%s2404_s21 + $0x350] sm:$0xff]  ;;  %v653_v54 = vld [vmem:[%s2404_s21 + $0x248] sm:$0xff] }
  0x1e   : > { %v655_v55 = vld [vmem:[%s2404_s21 + $0x258] sm:$0xff]  ;;  %v652_v56 = vld [vmem:[%s2404_s21 + $0x240] sm:$0xff]  ;;  %v654_v57 = vld [vmem:[%s2404_s21 + $0x250] sm:$0xff] }
  0x1f   : > { %v621_v58 = vld [vmem:[%s2404_s21 + $0x148] sm:$0xff]  ;;  %v623_v59 = vld [vmem:[%s2404_s21 + $0x158] sm:$0xff]  ;;  %v620_v60 = vld [vmem:[%s2404_s21 + $0x140] sm:$0xff] }
  0x20   : > { %v622_v61 = vld [vmem:[%s2404_s21 + $0x150] sm:$0xff]  ;;  %v589_v62 = vld [vmem:[%s2404_s21 + $0x48] sm:$0xff]  ;;  %v591_v63 = vld [vmem:[%s2404_s21 + $0x58] sm:$0xff] }
  0x21   : > { %v588_v1 = vld [vmem:[%s2404_s21 + $0x40] sm:$0xff]  ;;  %v590_v2 = vld [vmem:[%s2404_s21 + $0x50] sm:$0xff]  ;;  %v689_v3 = vld [vmem:[%s2404_s21 + $0x368] sm:$0xff] }
  0x22   : > { %v691_v4 = vld [vmem:[%s2404_s21 + $0x378] sm:$0xff]  ;;  %v688_v5 = vld [vmem:[%s2404_s21 + $0x360] sm:$0xff]  ;;  %v690_v6 = vld [vmem:[%s2404_s21 + $0x370] sm:$0xff] }
  0x23   : > { %v657_v7 = vld [vmem:[%s2404_s21 + $0x268] sm:$0xff]  ;;  %v624_v13 = vld [vmem:[%s2404_s21 + $0x160] sm:$0xff]  ;;  %v626_v14 = vld [vmem:[%s2404_s21 + $0x170] sm:$0xff] }
  0x24   : > { %v593_v15 = vld [vmem:[%s2404_s21 + $0x68] sm:$0xff]  ;;  %v592_v17 = vld [vmem:[%s2404_s21 + $0x60] sm:$0xff] }
  0x25   : > { %v693_v19 = vld [vmem:[%s2404_s21 + $0x388] sm:$0xff]  ;;  %v692_v21 = vld [vmem:[%s2404_s21 + $0x380] sm:$0xff] }
  0x26   : > { %v661_v23 = vld [vmem:[%s2404_s21 + $0x288] sm:$0xff]  ;;  %v660_v25 = vld [vmem:[%s2404_s21 + $0x280] sm:$0xff] }
  0x27   : > { %v629_v27 = vld [vmem:[%s2404_s21 + $0x188] sm:$0xff]  ;;  %v628_v29 = vld [vmem:[%s2404_s21 + $0x180] sm:$0xff] }
  0xd3   : > { %v481_v9 = vpop.f32.mrf.mxu0 }
  0xd4   : > { %v482_v10 = vadd.f32 %v2206_v8, %v481_v9  ;;  %v659_v8 = vld [vmem:[%s2404_s21 + $0x278] sm:$0xff]  ;;  %v656_v9 = vld [vmem:[%s2404_s21 + $0x260] sm:$0xff] }
  0xd5   : > { %v2246_v11 = vpop.f32.mrf.mxu0 }
  0xd6   : > { %v485_v12 = vmax.f32 %v482_v10, 0.0  ;;  %v658_v10 = vld [vmem:[%s2404_s21 + $0x270] sm:$0xff]  ;;  %v625_v11 = vld [vmem:[%s2404_s21 + $0x168] sm:$0xff] }
  0xd8   : > { %2256 = vmatmul.mubr.msk.f32.vlgmr.msra.gmra.mxu1 %vm497_vm2, %v485_v12  ;;  %v627_v12 = vld [vmem:[%s2404_s21 + $0x178] sm:$0xff] }
  0xd9   : > { %847 = vmatprep.mubr.f32.mxu1 %v2310_v0  ;;  %808 = vmatpush1.msra.mxu1 %v678_v16  ;;  %v595_v16 = vld [vmem:[%s2404_s21 + $0x78] sm:$0xff] }
  0xda   : > { %809 = vmatprep.subr.mxu1 %v647_v18  ;;  %v594_v18 = vld [vmem:[%s2404_s21 + $0x70] sm:$0xff] }
  0xdb   : > { %810 = vmatpush1.msra.mxu1 %v646_v20  ;;  %v695_v20 = vld [vmem:[%s2404_s21 + $0x398] sm:$0xff] }
  0xdc   : > { %811 = vmatprep.subr.mxu1 %v615_v22  ;;  %v694_v22 = vld [vmem:[%s2404_s21 + $0x390] sm:$0xff] }
  0xdd   : > { %812 = vmatpush1.msra.mxu1 %v614_v24  ;;  %v663_v24 = vld [vmem:[%s2404_s21 + $0x298] sm:$0xff] }
  0xde   : > { %813 = vmatprep.subr.mxu1 %v583_v26  ;;  %v662_v26 = vld [vmem:[%s2404_s21 + $0x290] sm:$0xff] }
  0xdf   : > { %814 = vmatpush1.msra.mxu1 %v582_v28  ;;  %v631_v28 = vld [vmem:[%s2404_s21 + $0x198] sm:$0xff] }
  0xe0   : > { %949 = vmatprep.subr.mxu1 %v683_v30  ;;  %v630_v30 = vld [vmem:[%s2404_s21 + $0x190] sm:$0xff] }
 0x198   : > { %v567_v32 = vpop.f32.mrf.mxu1 }
 0x199   : > { %v568_v33 = vadd.f32 %v2208_v31, %v567_v32  ;;  %v597_v31 = vld [vmem:[%s2404_s21 + $0x88] sm:$0xff]  ;;  %v599_v32 = vld [vmem:[%s2404_s21 + $0x98] sm:$0xff] }
 0x19a   : > { %v2257_v34 = vpop.f32.mrf.mxu1 }
 0x19b   : > { %572 = vst.msk [vmem:[#allocation2] sm:$0x3] %vm571_vm3, %v568_v33  ;;  %574 = vrot.lane.b32.xlu0 %v568_v33, %s2312_s29  ;;  %v596_v33 = vld [vmem:[%s2404_s21 + $0x80] sm:$0xff]  ;;  %v598_v34 = vld [vmem:[%s2404_s21 + $0x90] sm:$0xff] }
 0x1a2   : > { %v2430_v37 = vld [vmem:[#allocation2] sm:$0x3] }
 0x1a3   : > { %2210 = vmatmul.mubr.msk.f32.vlgmr.msra.gmra.mxu0 %vm497_vm2, %v2430_v37  ;;  %2211 = vmatmul.mubr.msk.f32.vlgmr.msra.gmra.mxu1 %vm497_vm2, %v2430_v37 }
 0x1a4   : > { %879 = vmatpush1.msra.mxu0 %v680_v35  ;;  %950 = vmatpush1.msra.mxu1 %v682_v36  ;;  %v697_v35 = vld [vmem:[%s2404_s21 + $0x3a8] sm:$0xff]  ;;  %v699_v36 = vld [vmem:[%s2404_s21 + $0x3b8] sm:$0xff] }
 0x1a5   : > { %880 = vmatprep.subr.mxu0 %v649_v38  ;;  %951 = vmatprep.subr.mxu1 %v651_v39  ;;  %v696_v38 = vld [vmem:[%s2404_s21 + $0x3a0] sm:$0xff]  ;;  %v698_v39 = vld [vmem:[%s2404_s21 + $0x3b0] sm:$0xff] }
 0x1a6   : > { %881 = vmatpush1.msra.mxu0 %v648_v40  ;;  %952 = vmatpush1.msra.mxu1 %v650_v41  ;;  %v665_v40 = vld [vmem:[%s2404_s21 + $0x2a8] sm:$0xff]  ;;  %v667_v41 = vld [vmem:[%s2404_s21 + $0x2b8] sm:$0xff] }
 0x1a7   : > { %882 = vmatprep.subr.mxu0 %v617_v42  ;;  %953 = vmatprep.subr.mxu1 %v619_v43  ;;  %v664_v42 = vld [vmem:[%s2404_s21 + $0x2a0] sm:$0xff]  ;;  %v666_v43 = vld [vmem:[%s2404_s21 + $0x2b0] sm:$0xff] }
 0x1a8   : > { %883 = vmatpush1.msra.mxu0 %v616_v44  ;;  %954 = vmatpush1.msra.mxu1 %v618_v45  ;;  %v633_v44 = vld [vmem:[%s2404_s21 + $0x1a8] sm:$0xff]  ;;  %v635_v45 = vld [vmem:[%s2404_s21 + $0x1b8] sm:$0xff] }
 0x1a9   : > { %884 = vmatprep.subr.mxu0 %v585_v46  ;;  %955 = vmatprep.subr.mxu1 %v587_v47  ;;  %v632_v46 = vld [vmem:[%s2404_s21 + $0x1a0] sm:$0xff]  ;;  %v634_v47 = vld [vmem:[%s2404_s21 + $0x1b0] sm:$0xff] }
 0x1aa   : > { %885 = vmatpush1.msra.mxu0 %v584_v48  ;;  %918 = vmatprep.mubr.f32.mxu0 %v2310_v0  ;;  %v601_v48 = vld [vmem:[%s2404_s21 + $0xa8] sm:$0xff] }
 0x1ab   : > { %956 = vmatpush1.msra.mxu1 %v586_v49  ;;  %989 = vmatprep.mubr.f32.mxu1 %v2310_v0  ;;  %v603_v49 = vld [vmem:[%s2404_s21 + $0xb8] sm:$0xff] }
 0x1ac   : > { %2212 = vmatmul.mubr.msk.f32.vlgmr.msra.gmra.mxu0 %vm497_vm2, %v2430_v37  ;;  %2213 = vmatmul.mubr.msk.f32.vlgmr.msra.gmra.mxu1 %vm497_vm2, %v2430_v37 }
 0x1ad   : > { %1020 = vmatprep.subr.mxu0 %v685_v50  ;;  %1091 = vmatprep.subr.mxu1 %v687_v51  ;;  %v600_v50 = vld [vmem:[%s2404_s21 + $0xa0] sm:$0xff]  ;;  %v602_v51 = vld [vmem:[%s2404_s21 + $0xb0] sm:$0xff] }
 0x1ae   : > { %1021 = vmatpush1.msra.mxu0 %v684_v52  ;;  %1092 = vmatpush1.msra.mxu1 %v686_v53  ;;  %v701_v52 = vld [vmem:[%s2404_s21 + $0x3c8] sm:$0xff]  ;;  %v703_v53 = vld [vmem:[%s2404_s21 + $0x3d8] sm:$0xff] }
 0x1af   : > { %1022 = vmatprep.subr.mxu0 %v653_v54  ;;  %1093 = vmatprep.subr.mxu1 %v655_v55  ;;  %v700_v54 = vld [vmem:[%s2404_s21 + $0x3c0] sm:$0xff]  ;;  %v702_v55 = vld [vmem:[%s2404_s21 + $0x3d0] sm:$0xff] }
 0x1b0   : > { %1023 = vmatpush1.msra.mxu0 %v652_v56  ;;  %1094 = vmatpush1.msra.mxu1 %v654_v57  ;;  %v669_v56 = vld [vmem:[%s2404_s21 + $0x2c8] sm:$0xff]  ;;  %v671_v57 = vld [vmem:[%s2404_s21 + $0x2d8] sm:$0xff] }
 0x1b1   : > { %1024 = vmatprep.subr.mxu0 %v621_v58  ;;  %1095 = vmatprep.subr.mxu1 %v623_v59  ;;  %v668_v58 = vld [vmem:[%s2404_s21 + $0x2c0] sm:$0xff]  ;;  %v670_v59 = vld [vmem:[%s2404_s21 + $0x2d0] sm:$0xff] }
 0x1b2   : > { %1025 = vmatpush1.msra.mxu0 %v620_v60  ;;  %1096 = vmatpush1.msra.mxu1 %v622_v61  ;;  %v637_v60 = vld [vmem:[%s2404_s21 + $0x1c8] sm:$0xff]  ;;  %v639_v61 = vld [vmem:[%s2404_s21 + $0x1d8] sm:$0xff] }
 0x1b3   : > { %1026 = vmatprep.subr.mxu0 %v589_v62  ;;  %1097 = vmatprep.subr.mxu1 %v591_v63  ;;  %v636_v62 = vld [vmem:[%s2404_s21 + $0x1c0] sm:$0xff]  ;;  %v638_v63 = vld [vmem:[%s2404_s21 + $0x1d0] sm:$0xff] }
 0x1b4   : > { %1027 = vmatpush1.msra.mxu0 %v588_v1  ;;  %1060 = vmatprep.mubr.f32.mxu0 %v2310_v0  ;;  %v605_v1 = vld [vmem:[%s2404_s21 + $0xc8] sm:$0xff] }
 0x1b5   : > { %1098 = vmatpush1.msra.mxu1 %v590_v2  ;;  %1131 = vmatprep.mubr.f32.mxu1 %v2310_v0  ;;  %v607_v2 = vld [vmem:[%s2404_s21 + $0xd8] sm:$0xff] }
 0x1b6   : > { %2214 = vmatmul.mubr.msk.f32.vlgmr.msra.gmra.mxu0 %vm497_vm2, %v2430_v37  ;;  %2215 = vmatmul.mubr.msk.f32.vlgmr.msra.gmra.mxu1 %vm497_vm2, %v2430_v37 }
 0x1b7   : > { %1162 = vmatprep.subr.mxu0 %v689_v3  ;;  %1233 = vmatprep.subr.mxu1 %v691_v4  ;;  %v604_v3 = vld [vmem:[%s2404_s21 + $0xc0] sm:$0xff]  ;;  %v606_v4 = vld [vmem:[%s2404_s21 + $0xd0] sm:$0xff] }
 0x1b8   : > { %1163 = vmatpush1.msra.mxu0 %v688_v5  ;;  %1234 = vmatpush1.msra.mxu1 %v690_v6  ;;  %v705_v5 = vld [vmem:[%s2404_s21 + $0x3e8] sm:$0xff]  ;;  %v707_v6 = vld [vmem:[%s2404_s21 + $0x3f8] sm:$0xff] }
 0x1b9   : > { %1164 = vmatprep.subr.mxu0 %v657_v7  ;;  %1235 = vmatprep.subr.mxu1 %v659_v8  ;;  %v704_v7 = vld [vmem:[%s2404_s21 + $0x3e0] sm:$0xff]  ;;  %v706_v8 = vld [vmem:[%s2404_s21 + $0x3f0] sm:$0xff] }
 0x1ba   : > { %1165 = vmatpush1.msra.mxu0 %v656_v9  ;;  %1236 = vmatpush1.msra.mxu1 %v658_v10  ;;  %v673_v9 = vld [vmem:[%s2404_s21 + $0x2e8] sm:$0xff]  ;;  %v675_v10 = vld [vmem:[%s2404_s21 + $0x2f8] sm:$0xff] }
 0x1bb   : > { %1166 = vmatprep.subr.mxu0 %v625_v11  ;;  %1237 = vmatprep.subr.mxu1 %v627_v12  ;;  %v672_v11 = vld [vmem:[%s2404_s21 + $0x2e0] sm:$0xff]  ;;  %v674_v12 = vld [vmem:[%s2404_s21 + $0x2f0] sm:$0xff] }
 0x1bc   : > { %1167 = vmatpush1.msra.mxu0 %v624_v13  ;;  %1238 = vmatpush1.msra.mxu1 %v626_v14  ;;  %v641_v13 = vld [vmem:[%s2404_s21 + $0x1e8] sm:$0xff]  ;;  %v643_v14 = vld [vmem:[%s2404_s21 + $0x1f8] sm:$0xff] }
 0x1bd   : > { %1168 = vmatprep.subr.mxu0 %v593_v15  ;;  %1239 = vmatprep.subr.mxu1 %v595_v16  ;;  %v640_v15 = vld [vmem:[%s2404_s21 + $0x1e0] sm:$0xff]  ;;  %v642_v16 = vld [vmem:[%s2404_s21 + $0x1f0] sm:$0xff] }
 0x1be   : > { %1169 = vmatpush1.msra.mxu0 %v592_v17  ;;  %1202 = vmatprep.mubr.f32.mxu0 %v2310_v0  ;;  %v609_v17 = vld [vmem:[%s2404_s21 + $0xe8] sm:$0xff] }
 0x1bf   : > { %1240 = vmatpush1.msra.mxu1 %v594_v18  ;;  %1273 = vmatprep.mubr.f32.mxu1 %v2310_v0  ;;  %v611_v18 = vld [vmem:[%s2404_s21 + $0xf8] sm:$0xff] }
 0x1c0   : > { %2216 = vmatmul.mubr.msk.f32.vlgmr.msra.gmra.mxu0 %vm497_vm2, %v2430_v37  ;;  %2217 = vmatmul.mubr.msk.f32.vlgmr.msra.gmra.mxu1 %vm497_vm2, %v2430_v37 }
 0x1c1   : > { %1304 = vmatprep.subr.mxu0 %v693_v19  ;;  %1375 = vmatprep.subr.mxu1 %v695_v20  ;;  %v608_v19 = vld [vmem:[%s2404_s21 + $0xe0] sm:$0xff]  ;;  %v610_v20 = vld [vmem:[%s2404_s21 + $0xf0] sm:$0xff] }
 0x1c2   : > { %1305 = vmatpush1.msra.mxu0 %v692_v21  ;;  %1376 = vmatpush1.msra.mxu1 %v694_v22  ;;  %v2313_v22 = vmov 1983009808  }
 0x1c3   : > { %1306 = vmatprep.subr.mxu0 %v661_v23  ;;  %1377 = vmatprep.subr.mxu1 %v663_v24  ;;  %v1883_v23 = vunpack.c.l.s4 %v2313_v22  ;;  %v1885_v24 = vlaneseq }
 0x1c4   : > { %1307 = vmatpush1.msra.mxu0 %v660_v25  ;;  %1378 = vmatpush1.msra.mxu1 %v662_v26 }
 0x1c5   : > { %1308 = vmatprep.subr.mxu0 %v629_v27  ;;  %1379 = vmatprep.subr.mxu1 %v631_v28  ;;  %v1884_v25 = vunpack.c.0.s8 %v1883_v23 }
 0x1c6   : > { %1309 = vmatpush1.msra.mxu0 %v628_v29  ;;  %1380 = vmatpush1.msra.mxu1 %v630_v30 }
 0x1c7   : > { %1310 = vmatprep.subr.mxu0 %v597_v31  ;;  %1381 = vmatprep.subr.mxu1 %v599_v32 }
 0x1c8   : > { %1311 = vmatpush1.msra.mxu0 %v596_v33  ;;  %1344 = vmatprep.mubr.f32.mxu0 %v2310_v0 }
 0x1c9   : > { %1382 = vmatpush1.msra.mxu1 %v598_v34  ;;  %1415 = vmatprep.mubr.f32.mxu1 %v2310_v0 }
 0x1ca   : > { %2218 = vmatmul.mubr.msk.f32.vlgmr.msra.gmra.mxu0 %vm497_vm2, %v2430_v37  ;;  %2219 = vmatmul.mubr.msk.f32.vlgmr.msra.gmra.mxu1 %vm497_vm2, %v2430_v37 }
 0x1cb   : > { %1446 = vmatprep.subr.mxu0 %v697_v35  ;;  %1517 = vmatprep.subr.mxu1 %v699_v36 }
 0x1cc   : > { %1447 = vmatpush1.msra.mxu0 %v696_v38  ;;  %1518 = vmatpush1.msra.mxu1 %v698_v39 }
 0x1cd   : > { %1448 = vmatprep.subr.mxu0 %v665_v40  ;;  %1519 = vmatprep.subr.mxu1 %v667_v41 }
 0x1ce   : > { %1449 = vmatpush1.msra.mxu0 %v664_v42  ;;  %1520 = vmatpush1.msra.mxu1 %v666_v43 }
 0x1cf   : > { %1450 = vmatprep.subr.mxu0 %v633_v44  ;;  %1521 = vmatprep.subr.mxu1 %v635_v45 }
 0x1d0   : > { %1451 = vmatpush1.msra.mxu0 %v632_v46  ;;  %1522 = vmatpush1.msra.mxu1 %v634_v47 }
 0x1d1   : > { %1452 = vmatprep.subr.mxu0 %v601_v48  ;;  %1523 = vmatprep.subr.mxu1 %v603_v49 }
 0x1d2   : > { %1453 = vmatpush1.msra.mxu0 %v600_v50  ;;  %1486 = vmatprep.mubr.f32.mxu0 %v2310_v0 }
 0x1d3   : > { %1524 = vmatpush1.msra.mxu1 %v602_v51  ;;  %1557 = vmatprep.mubr.f32.mxu1 %v2310_v0 }
 0x1d4   : > { %2220 = vmatmul.mubr.msk.f32.vlgmr.msra.gmra.mxu0 %vm497_vm2, %v2430_v37  ;;  %2221 = vmatmul.mubr.msk.f32.vlgmr.msra.gmra.mxu1 %vm497_vm2, %v2430_v37 }
 0x1d5   : > { %1588 = vmatprep.subr.mxu0 %v701_v52  ;;  %1659 = vmatprep.subr.mxu1 %v703_v53 }
 0x1d6   : > { %1589 = vmatpush1.msra.mxu0 %v700_v54  ;;  %1660 = vmatpush1.msra.mxu1 %v702_v55 }
 0x1d7   : > { %1590 = vmatprep.subr.mxu0 %v669_v56  ;;  %1661 = vmatprep.subr.mxu1 %v671_v57 }
 0x1d8   : > { %1591 = vmatpush1.msra.mxu0 %v668_v58  ;;  %1662 = vmatpush1.msra.mxu1 %v670_v59 }
 0x1d9   : > { %1592 = vmatprep.subr.mxu0 %v637_v60  ;;  %1663 = vmatprep.subr.mxu1 %v639_v61 }
 0x1da   : > { %1593 = vmatpush1.msra.mxu0 %v636_v62  ;;  %1664 = vmatpush1.msra.mxu1 %v638_v63 }
 0x1db   : > { %1594 = vmatprep.subr.mxu0 %v605_v1  ;;  %1665 = vmatprep.subr.mxu1 %v607_v2 }
 0x1dc   : > { %1595 = vmatpush1.msra.mxu0 %v604_v3  ;;  %1628 = vmatprep.mubr.f32.mxu0 %v2310_v0 }
 0x1dd   : > { %1666 = vmatpush1.msra.mxu1 %v606_v4  ;;  %1699 = vmatprep.mubr.f32.mxu1 %v2310_v0 }
 0x1de   : > { %2222 = vmatmul.mubr.msk.f32.vlgmr.msra.gmra.mxu0 %vm497_vm2, %v2430_v37  ;;  %2223 = vmatmul.mubr.msk.f32.vlgmr.msra.gmra.mxu1 %vm497_vm2, %v2430_v37 }
 0x1df   : > { %1730 = vmatprep.subr.mxu0 %v705_v5  ;;  %1801 = vmatprep.subr.mxu1 %v707_v6 }
 0x1e0   : > { %1731 = vmatpush1.msra.mxu0 %v704_v7  ;;  %1802 = vmatpush1.msra.mxu1 %v706_v8 }
 0x1e1   : > { %1732 = vmatprep.subr.mxu0 %v673_v9  ;;  %1803 = vmatprep.subr.mxu1 %v675_v10 }
 0x1e2   : > { %1733 = vmatpush1.msra.mxu0 %v672_v11  ;;  %1804 = vmatpush1.msra.mxu1 %v674_v12 }
 0x1e3   : > { %1734 = vmatprep.subr.mxu0 %v641_v13  ;;  %1805 = vmatprep.subr.mxu1 %v643_v14 }
 0x1e4   : > { %1735 = vmatpush1.msra.mxu0 %v640_v15  ;;  %1806 = vmatpush1.msra.mxu1 %v642_v16 }
 0x1e5   : > { %1736 = vmatprep.subr.mxu0 %v609_v17  ;;  %1807 = vmatprep.subr.mxu1 %v611_v18 }
 0x1e6   : > { %1737 = vmatpush1.msra.mxu0 %v608_v19  ;;  %1770 = vmatprep.mubr.f32.mxu0 %v2310_v0 }
 0x1e7   : > { %1808 = vmatpush1.msra.mxu1 %v610_v20  ;;  %1841 = vmatprep.mubr.f32.mxu1 %v2310_v0  ;;  %v1886_v0 = vshrl.u32 %v1885_v24, 7 }
 0x1e8   : > { %2224 = vmatmul.mubr.msk.f32.vlgmr.msra.gmra.mxu0 %vm497_vm2, %v2430_v37  ;;  %2225 = vmatmul.mubr.msk.f32.vlgmr.msra.gmra.mxu1 %vm497_vm2, %v2430_v37 }
 0x1e9   : > { %v2590_v28 = vsub.s32 %v1884_v25, %v1886_v0 }
 0x20d   : > { %v575_v21 = vpop.permute.xlu0 %574 }
 0x20e   : > { %578 = vst.msk [vmem:[%s396_s10] sm:$0x3] %vm577_vm4, %v575_v21 }
 0x263   : > { %v778_v26 = vpop.f32.mrf.mxu0  ;;  %v849_v27 = vpop.f32.mrf.mxu1 }
 0x265   : > { %v780_v29 = vpop.f32.mrf.mxu0  ;;  %v851_v37 = vpop.f32.mrf.mxu1 }
 0x266   : > { %v1880_v30 = vcombine.low %v778_v26, %v780_v29  ;;  %v1881_v31 = vcombine.low %v849_v27, %v851_v37 }
 0x268   : > { %v1888_v32 = vrot.slane %v1880_v30, %v2590_v28  ;;  %v1895_v33 = vrot.slane %v1881_v31, %v2590_v28 }
 0x26a   : > { %v1896_v34 = vcombine.low %v1888_v32, %v1895_v33 }
 0x26c   : > { %2024 = vst [vmem:[%s2598_s14] sm:$0xff] %v1896_v34  ;;  %v920_v35 = vpop.f32.mrf.mxu0  ;;  %v991_v36 = vpop.f32.mrf.mxu1 }
 0x26e   : > { %v922_v38 = vpop.f32.mrf.mxu0  ;;  %v993_v39 = vpop.f32.mrf.mxu1 }
 0x26f   : > { %v1897_v40 = vcombine.low %v920_v35, %v922_v38  ;;  %v1898_v41 = vcombine.low %v991_v36, %v993_v39 }
 0x271   : > { %v1905_v42 = vrot.slane %v1897_v40, %v2590_v28  ;;  %v1912_v43 = vrot.slane %v1898_v41, %v2590_v28 }
 0x273   : > { %v1913_v44 = vcombine.low %v1905_v42, %v1912_v43 }
 0x275   : > { %2025 = vst [vmem:[%s2598_s14 + $0x8] sm:$0xff] %v1913_v44 }
 0x276   : > { %v1062_v45 = vpop.f32.mrf.mxu0  ;;  %v1133_v46 = vpop.f32.mrf.mxu1 }
 0x278   : > { %v1064_v47 = vpop.f32.mrf.mxu0  ;;  %v1135_v48 = vpop.f32.mrf.mxu1 }
 0x279   : > { %v1914_v49 = vcombine.low %v1062_v45, %v1064_v47  ;;  %v1915_v50 = vcombine.low %v1133_v46, %v1135_v48 }
 0x27b   : > { %v1922_v51 = vrot.slane %v1914_v49, %v2590_v28  ;;  %v1929_v52 = vrot.slane %v1915_v50, %v2590_v28 }
 0x27d   : > { %v1930_v53 = vcombine.low %v1922_v51, %v1929_v52 }
 0x27f   : > { %2026 = vst [vmem:[%s2598_s14 + $0x10] sm:$0xff] %v1930_v53 }
 0x280   : > { %v1204_v54 = vpop.f32.mrf.mxu0  ;;  %v1275_v55 = vpop.f32.mrf.mxu1 }
 0x282   : > { %v1206_v56 = vpop.f32.mrf.mxu0  ;;  %v1277_v57 = vpop.f32.mrf.mxu1 }
 0x283   : > { %v1931_v58 = vcombine.low %v1204_v54, %v1206_v56  ;;  %v1932_v59 = vcombine.low %v1275_v55, %v1277_v57 }
 0x285   : > { %v1939_v60 = vrot.slane %v1931_v58, %v2590_v28  ;;  %v1946_v61 = vrot.slane %v1932_v59, %v2590_v28 }
 0x287   : > { %v1947_v62 = vcombine.low %v1939_v60, %v1946_v61 }
 0x289   : > { %2027 = vst [vmem:[%s2598_s14 + $0x18] sm:$0xff] %v1947_v62 }
 0x28a   : > { %v1346_v63 = vpop.f32.mrf.mxu0  ;;  %v1417_v1 = vpop.f32.mrf.mxu1 }
 0x28c   : > { %v1348_v2 = vpop.f32.mrf.mxu0  ;;  %v1419_v3 = vpop.f32.mrf.mxu1 }
 0x28d   : > { %v1948_v4 = vcombine.low %v1346_v63, %v1348_v2  ;;  %v1949_v5 = vcombine.low %v1417_v1, %v1419_v3 }
 0x28f   : > { %v1956_v6 = vrot.slane %v1948_v4, %v2590_v28  ;;  %v1963_v7 = vrot.slane %v1949_v5, %v2590_v28 }
 0x291   : > { %v1964_v8 = vcombine.low %v1956_v6, %v1963_v7 }
 0x293   : > { %2028 = vst [vmem:[%s2598_s14 + $0x20] sm:$0xff] %v1964_v8 }
 0x294   : > { %v1488_v9 = vpop.f32.mrf.mxu0  ;;  %v1559_v10 = vpop.f32.mrf.mxu1 }
 0x296   : > { %v1490_v11 = vpop.f32.mrf.mxu0  ;;  %v1561_v12 = vpop.f32.mrf.mxu1 }
 0x297   : > { %v1965_v13 = vcombine.low %v1488_v9, %v1490_v11  ;;  %v1966_v14 = vcombine.low %v1559_v10, %v1561_v12 }
 0x299   : > { %v1973_v15 = vrot.slane %v1965_v13, %v2590_v28  ;;  %v1980_v16 = vrot.slane %v1966_v14, %v2590_v28 }
 0x29b   : > { %v1981_v17 = vcombine.low %v1973_v15, %v1980_v16 }
 0x29d   : > { %2029 = vst [vmem:[%s2598_s14 + $0x28] sm:$0xff] %v1981_v17 }
 0x29e   : > { %v1630_v18 = vpop.f32.mrf.mxu0  ;;  %v1701_v19 = vpop.f32.mrf.mxu1 }
 0x2a0   : > { %v1632_v20 = vpop.f32.mrf.mxu0  ;;  %v1703_v21 = vpop.f32.mrf.mxu1 }
 0x2a1   : > { %v1982_v22 = vcombine.low %v1630_v18, %v1632_v20  ;;  %v1983_v23 = vcombine.low %v1701_v19, %v1703_v21 }
 0x2a3   : > { %v1990_v24 = vrot.slane %v1982_v22, %v2590_v28  ;;  %v1997_v25 = vrot.slane %v1983_v23, %v2590_v28 }
 0x2a5   : > { %v1998_v0 = vcombine.low %v1990_v24, %v1997_v25 }
 0x2a7   : > { %2030 = vst [vmem:[%s2598_s14 + $0x30] sm:$0xff] %v1998_v0 }
 0x2a8   : > { %v1772_v26 = vpop.f32.mrf.mxu0  ;;  %v1843_v27 = vpop.f32.mrf.mxu1 }
 0x2aa   : > { %v1774_v29 = vpop.f32.mrf.mxu0  ;;  %v1845_v37 = vpop.f32.mrf.mxu1 }
 0x2ab   : > { %v1999_v30 = vcombine.low %v1772_v26, %v1774_v29  ;;  %v2000_v31 = vcombine.low %v1843_v27, %v1845_v37 }
 0x2ad   : > { %v2007_v32 = vrot.slane %v1999_v30, %v2590_v28  ;;  %v2014_v33 = vrot.slane %v2000_v31, %v2590_v28 }
 0x2af   : > { %v2015_v34 = vcombine.low %v2007_v32, %v2014_v33 }
 0x2b1   : > { %2031 = vst [vmem:[%s2598_s14 + $0x38] sm:$0xff] %v2015_v34 }
 0x2b2 PF: > { %s18_s26 = sadd.s32 1, %s2308_s26   ;;  %s2639_s24 = smov %s2304_s25 }
 0x2b3   : > { %p15_p5 = scmp.ge.s32.totalorder %s18_s26, 6   ;;  %s2640_s25 = smov %s2642_s27 }
 0x2b5   :  { %17 = sbr.rel (!%p15_p5) target bundleno = 2 (0x2), region = 102 }

// kernel: scalable_self_attention.3
= control target key start
LH: loop header
LB: loop body
LE: loop exit
PB: predicated region body
PF: predicated region fallthrough
CT: control target
= control target key end

     0   :  { %8 = vsyncpa [#allocation4], 0  ;;  %s2455_s0 = inlined_call_operand.vmem [shape: f32[2,8,64], index: 0, kind: input, shape index: {}]   ;;  %s2456_s1 = inlined_call_operand.vmem [shape: f32[2,64,256], index: 1, kind: input, shape index: {}]   ;;  %s2457_s2 = inlined_call_operand.vmem [shape: f32[4,2,1,64], index: 2, kind: input, shape index: {}]   ;;  %s2458_s3 = inlined_call_operand.hbm [shape: f32[2,8,64], index: 3, kind: output, shape index: {}]  }
   0x1   :  { %10 = vsyncpa [#allocation4 + $0x1], 0  ;;  %s2119_s12 = smov 0   ;;  %s2121_s13 = smov 0  }
   0x2   :  { %s2123_s14 = smov 0   ;;  %s2125_s15 = smov 0  }
   0x3 LB: > { %s2140_s16 = sadd.s32 4294967295, %s2085_s15   ;;  %s1831_s17 = sadd.s32 4294967294, %s2085_s15   ;;  %s2085_s15 = sphi %s2125_s15, %s2464_s15   ;;  %s2081_s14 = sphi %s2123_s14, %s2463_s14   ;;  %s2077_s13 = sphi %s2121_s13, %s2462_s13   ;;  %s2073_s12 = sphi %s2119_s12, %s2461_s12  }
   0x4   : > { %s2144_s18 = sadd.s32 1, %s2085_s15   ;;  %s75_s19 = sadd.s32 1, %s2081_s14 }
   0x5   : > { %s72_s20 = ssub.s32 %s2085_s15, %s2144_s18  ;;  %p82_p0 = scmp.ne.s32.totalorder %s2081_s14, %s2077_s13 }
   0x6   : > { %p73_p1 = scmp.eq.s32.totalorder %s72_s20, 0  ;;  %p83_p2 = scmp.eq.s32.totalorder %s2085_s15, 0 }
   0x7   : > { %p112_p3 = scmp.eq.s32.totalorder %s2140_s16, 1  ;;  %p117_p4 = scmp.ne.s32.totalorder %s2077_s13, %s2073_s12 }
   0x8   : > { %s2156_s21 = scalar_select %p73_p1, %s2081_s14, %s75_s19  }
   0x9   : > { %p84_p5 = por %p83_p2, %p82_p0  ;;  %p2158_p6 = por %p112_p3, %p82_p0 }
   0xa   : > { %p118_p7 = scmp.eq.s32.totalorder %s1831_s17, 1  ;;  %p1833_p9 = scmp.ge.s32.totalorder %s2085_s15, 2 }
   0xc   : > { %p2162_p8 = por %p118_p7, %p117_p4  ;;  %134 = sbr.rel (%p1833_p9) target bundleno = 23 (0x17), region = 16 }
  0x11   : > { %152 = sbr.rel (!%p84_p5) target bundleno = 23 (0x17), region = 28  ;;  %s154_s24 = sand.u32 (%p84_p5), 1, %s2081_s14  }
  0x12   : > { %s157_s27 = scalar_lea.vmem (%p84_p5), %s2457_s2, %s2085_s15  ;;  %s1834_s28 = sshll.u32 (%p84_p5), %s154_s24, 2 }
  0x13   : > { %v174_v0 = vld [vmem:[%s157_s27] sm:$0x1] (%p84_p5)  ;;  %v176_v1 = vld [vmem:[%s157_s27 + $0x2] sm:$0x1] (%p84_p5)  ;;  %v178_v2 = vld [vmem:[%s157_s27 + $0x4] sm:$0x1] (%p84_p5) }
  0x14   : > { %v180_v3 = vld [vmem:[%s157_s27 + $0x6] sm:$0x1] (%p84_p5)  ;;  %s156_s29 = scalar_lea.vmem (%p84_p5), [#allocation2], %s1834_s28 }
  0x15   : > { %175 = vst [vmem:[%s156_s29] sm:$0x1] (%p84_p5), %v174_v0  ;;  %177 = vst [vmem:[%s156_s29 + $0x1] sm:$0x1] (%p84_p5), %v176_v1 }
  0x16   : > { %179 = vst [vmem:[%s156_s29 + $0x2] sm:$0x1] %v178_v2  ;;  %181 = vst [vmem:[%s156_s29 + $0x3] sm:$0x1] %v180_v3 }
  0x17 PF: > { %p1835_p10 = scmp.ge.s32.totalorder %s2085_s15, 1  ;;  %p204_p11 = scmp.lt.s32.totalorder %s2085_s15, 3 }
  0x19   : > { %p205_p12 = pnand %p1835_p10, %p204_p11 }
  0x1a   : > { %p243_p13 = scmp.lt.s32.totalorder (!%p205_p12), %s2140_s16, 1  ;;  %s2178_s30 = sand.u32 (!%p205_p12), 1, %s2077_s13  }
  0x1b   : > { %208 = sbr.rel (%p205_p12) target bundleno = 1610 (0x64a), region = 62  ;;  %s1836_s4 = sshll.u32 (!%p205_p12), %s2178_s30, 2 }
  0x1c   : > { %s2187_s7 = scalar_lea.vmem (!%p205_p12), [#allocation2], %s1836_s4  ;;  %s2088_s11 = smov (!%p205_p12), 64  }
  0x1d   : > { %s2089_s25 = smov (!%p205_p12), 96   ;;  %s2090_s26 = smov (!%p205_p12), 112  }
  0x1e   : > { %s2091_s27 = smov (!%p205_p12), 80   ;;  %s2095_s28 = smov (!%p205_p12), 48  }
  0x1f   : > { %s2096_s29 = smov (!%p205_p12), 16   ;;  %s2097_s4 = smov (!%p205_p12), 32  }
  0x20   : > { %v2087_v4 = vmov 0.0   ;;  %s2184_s5 = scalar_select %p243_p13, %s2140_s16, 1  ;;  %v1844_v5 = vld [vmem:[%s2187_s7 + $0x1] ss:$0 sm:$0xff]  ;;  %vm269_vm0 = vcmask 523264   ;;  %vm2092_vm1 = vmmov 0   ;;  %v388_v35 = vlaneseq }
  0x21   : > { %337 = vmatprep.mubr.f32.mxu0 %v2087_v4  ;;  %1900 = vmatprep.subr.mxu1 %v2087_v4  ;;  %v1842_v26 = vld [vmem:[%s2187_s7] ss:$0 sm:$0xff]  ;;  %v2093_v33 = vmov 1983009808   ;;  %v2094_v37 = vmov 1934713408  }
  0x22   : > { %s1874_s6 = sshll.u32 %s2184_s5, 7  ;;  %360 = vrot.lane.b32.xlu0 %v1844_v5, %s2088_s11  ;;  %s1838_s17 = sshll.u32 %s2184_s5, 3  ;;  %1902 = vmatprep.mubr.msk.f32.mxu1 %vm2092_vm1, %v2087_v4  ;;  %v386_v34 = vunpack.c.l.s4 %v2093_v33  ;;  %v418_v38 = vunpack.c.l.s4 %v2094_v37  ;;  %v389_v40 = vshrl.u32 %v388_v35, 7  ;;  %vm820_vm2 = vcmask 130048  }
  0x23   : > { %s2193_s10 = scalar_lea.vmem %s2456_s1, %s1874_s6  ;;  %s246_s24 = scalar_lea.vmem %s2455_s0, %s1838_s17  ;;  %vm1125_vm3 = vcmask 64512   ;;  %vm1611_vm4 = vcmask 261120   ;;  %vm1613_vm5 = vcmask 392192  }
  0x24   : > { %v2197_v6 = vld [vmem:[%s2193_s10 + $0x78] sm:$0xff]  ;;  %v267_v7 = vld [vmem:[%s2193_s10 + $0x70] sm:$0xff]  ;;  %v2201_v8 = vld [vmem:[%s2193_s10 + $0x68] sm:$0xff]  ;;  %v387_v39 = vunpack.c.0.s8 %v386_v34  ;;  %v419_v43 = vunpack.c.0.s8 %v418_v38  ;;  %s1837_s5 = sshll.u32 %s2178_s30, 3  ;;  %s1871_s6 = sshll.u32 %s2140_s16, 7 }
  0x25   : > { %289 = vmatprep.subr.mxu0 %v2197_v6  ;;  %v265_v9 = vld [vmem:[%s2193_s10 + $0x60] sm:$0xff]  ;;  %v2206_v10 = vld [vmem:[%s2193_s10 + $0x58] sm:$0xff]  ;;  %v263_v11 = vld [vmem:[%s2193_s10 + $0x50] sm:$0xff]  ;;  %s242_s8 = scalar_lea.vmem [#allocation3], %s1837_s5  ;;  %s2417_s17 = scalar_lea.hbm %s2458_s3, %s1871_s6 }
  0x26   : > { %290 = vmatpush1.msra.mxu0 %v267_v7  ;;  %v2211_v12 = vld [vmem:[%s2193_s10 + $0x48] sm:$0xff]  ;;  %v261_v13 = vld [vmem:[%s2193_s10 + $0x40] sm:$0xff]  ;;  %v2216_v14 = vld [vmem:[%s2193_s10 + $0x38] sm:$0xff]  ;;  %v2257_v44 = vsub.s32 %v387_v39, %v389_v40  ;;  %v2259_v51 = vsub.s32 %v419_v43, %v389_v40  ;;  %s1743_s9 = sshll.u32 %s242_s8, 4  ;;  %s1730_s19 = scalar_lea.sflag [#allocation4], %s2178_s30  ;;  %s1744_s9 = int_to_ptr.vmem [resolvable:$true] %s1743_s9 }
  0x27   : > { %291 = vmatprep.subr.mxu0 %v2201_v8  ;;  %v259_v15 = vld [vmem:[%s2193_s10 + $0x30] sm:$0xff]  ;;  %v2221_v16 = vld [vmem:[%s2193_s10 + $0x28] sm:$0xff]  ;;  %v257_v17 = vld [vmem:[%s2193_s10 + $0x20] sm:$0xff]  ;;  %s2025_s20 = scalar_lea.vmem %s1744_s9, 128  ;;  %s2098_s16 = smov [#allocation3]  }
  0x28   : > { %292 = vmatpush1.msra.mxu0 %v265_v9  ;;  %v2227_v18 = vld [vmem:[%s2193_s10 + $0x18] sm:$0xff]  ;;  %v255_v19 = vld [vmem:[%s2193_s10 + $0x10] sm:$0xff]  ;;  %v2235_v20 = vld [vmem:[%s2193_s10 + $0x8] sm:$0xff]  ;;  %p2026_p0 = scmp.ne.s32.totalorder %s1744_s9, %s2025_s20 }
  0x29   : > { %293 = vmatprep.subr.mxu0 %v2206_v10  ;;  %v253_v21 = vld [vmem:[%s2193_s10] sm:$0xff] }
  0x2a   : > { %294 = vmatpush1.msra.mxu0 %v263_v11  ;;  %v252_v22 = vld [vmem:[%s246_s24] sm:$0xff]  ;;  %p2027_p1 = pnand %p2026_p0, %p2158_p6 }
  0x2b   : > { %295 = vmatprep.subr.mxu0 %v2211_v12 }
  0x2c   : > { %296 = vmatpush1.msra.mxu0 %v261_v13  ;;  %p2028_p2 = pneg %p2027_p1 }
  0x2d   : > { %297 = vmatprep.subr.mxu0 %v2216_v14 }
  0x2e   : > { %298 = vmatpush1.msra.mxu0 %v259_v15 }
  0x2f   : > { %299 = vmatprep.subr.mxu0 %v2221_v16 }
  0x30   : > { %300 = vmatpush1.msra.mxu0 %v257_v17 }
  0x31   : > { %301 = vmatprep.subr.mxu0 %v2227_v18 }
  0x32   : > { %302 = vmatpush1.msra.mxu0 %v255_v19 }
  0x33   : > { %303 = vmatprep.subr.mxu0 %v2235_v20 }
  0x34   : > { %304 = vmatpush1.msra.mxu0 %v253_v21 }
  0x35   : > { %1841 = vmatmul.mubr.msk.f32.vlgmr.msra.gmra.mxu0 %vm269_vm0, %v252_v22  ;;  %1940 = vmatprep.subr.mxu0 %v2087_v4 }
  0x36   : > { %1956 = vmatprep.mubr.msk.f32.mxu0 %vm2092_vm1, %v2087_v4 }
  0x94   : > { %v361_v23 = vpop.permute.xlu0 %360 }
  0xf5   : > { %v339_v24 = vpop.f32.mrf.mxu0 }
  0xf6   : > { %v363_v25 = vadd.f32 %v361_v23, %v339_v24  ;;  %v351_v27 = vadd.f32 %v1842_v26, %v339_v24 }
  0xf8   : > { %522 = vrot.lane.b32.xlu1 %v363_v25, %s2089_s25  ;;  %520 = vrot.lane.b32.xlu0 %v363_v25, %s2090_s26  ;;  %v352_v28 = vmul.f32 0.25, %v351_v27 }
  0xfc   : > { %524 = vrot.lane.b32.xlu1 %v363_v25, %s2091_s27  ;;  %526 = vrot.lane.b32.xlu0 %v363_v25, %s2088_s11 }
 0x100   : > { %374 = vrot.lane.b32.xlu0 %v352_v28, %s2090_s26 }
 0x16a   : > { %v523_v29 = vpop.permute.xlu1 %522  ;;  %v521_v30 = vpop.permute.xlu0 %520 }
 0x16b   : > { %528 = vrot.lane.b32.xlu1 %v521_v30, %s2088_s11  ;;  %530 = vrot.lane.b32.xlu0 %v523_v29, %s2088_s11 }
 0x16e   : > { %v525_v31 = vpop.permute.xlu1 %524  ;;  %v527_v32 = vpop.permute.xlu0 %526 }
 0x16f   : > { %532 = vrot.lane.b32.xlu1 %v525_v31, %s2088_s11  ;;  %380 = vrot.lane.b32.xlu0 %v352_v28, %s2091_s27 }
 0x172   : > { %v375_v36 = vpop.permute.xlu0 %374 }
 0x173   : > { %377 = vrot.lane.b32.xlu1 %v352_v28, %s2089_s25 }
 0x1dd   : > { %v529_v41 = vpop.permute.xlu1 %528  ;;  %v531_v42 = vpop.permute.xlu0 %530 }
 0x1de   : > { %v538_v45 = vcombine.low %v527_v32, %v531_v42  ;;  %v539_v46 = vcombine.high %v527_v32, %v531_v42 }
 0x1e0   : > { %v546_v52 = vrot.slane %v538_v45, %v2257_v44  ;;  %v553_v53 = vrot.slane %v539_v46, %v2257_v44 }
 0x1e1   : > { %v533_v47 = vpop.permute.xlu1 %532  ;;  %v381_v50 = vpop.permute.xlu0 %380 }
 0x1e2   : > { %v554_v48 = vcombine.low %v529_v41, %v533_v47  ;;  %v555_v49 = vcombine.high %v529_v41, %v533_v47  ;;  %v399_v56 = vcombine.low %v375_v36, %v381_v50  ;;  %v400_v57 = vcombine.high %v375_v36, %v381_v50 }
 0x1e4   : > { %v562_v54 = vrot.slane %v554_v48, %v2257_v44  ;;  %v569_v55 = vrot.slane %v555_v49, %v2257_v44  ;;  %v407_v7 = vrot.slane %v399_v56, %v2257_v44  ;;  %v414_v9 = vrot.slane %v400_v57, %v2257_v44 }
 0x1e5   : > { %v378_v58 = vpop.permute.xlu1 %377 }
 0x1e6   : > { %v570_v59 = vcombine.low %v546_v52, %v562_v54  ;;  %v571_v60 = vcombine.high %v546_v52, %v562_v54  ;;  %v586_v61 = vcombine.low %v553_v53, %v569_v55  ;;  %v587_v62 = vcombine.high %v553_v53, %v569_v55 }
 0x1e7   : > { %v383_v63 = vcombine.low %v352_v28, %v378_v58  ;;  %v384_v0 = vcombine.high %v352_v28, %v378_v58 }
 0x1e8   : > { %v578_v1 = vrot.slane %v570_v59, %v2259_v51  ;;  %v585_v2 = vrot.slane %v571_v60, %v2259_v51  ;;  %v594_v3 = vrot.slane %v586_v61, %v2259_v51  ;;  %v601_v5 = vrot.slane %v587_v62, %v2259_v51 }
 0x1e9   : > { %v391_v11 = vrot.slane %v383_v63, %v2257_v44  ;;  %v398_v13 = vrot.slane %v384_v0, %v2257_v44 }
 0x1ea   : > { %v606_v15 = vcombine.low %v578_v1, %v585_v2  ;;  %v1849_v17 = vcombine.high %v578_v1, %v585_v2  ;;  %v622_v19 = vcombine.low %v594_v3, %v601_v5  ;;  %v1850_v21 = vcombine.high %v594_v3, %v601_v5 }
 0x1eb   : > { %v415_v22 = vcombine.low %v391_v11, %v407_v7  ;;  %v416_v23 = vcombine.high %v391_v11, %v407_v7  ;;  %v431_v24 = vcombine.low %v398_v13, %v414_v9  ;;  %v432_v25 = vcombine.high %v398_v13, %v414_v9 }
 0x1ec   : > { %v613_v26 = vrot.slane %v606_v15, %v2257_v44  ;;  %v621_v27 = vrot.slane %v1849_v17, %v2257_v44  ;;  %v629_v28 = vrot.slane %v622_v19, %v2257_v44  ;;  %v637_v29 = vrot.slane %v1850_v21, %v2257_v44 }
 0x1ed   : > { %v423_v30 = vrot.slane %v415_v22, %v2259_v51  ;;  %v430_v31 = vrot.slane %v416_v23, %v2259_v51  ;;  %v439_v32 = vrot.slane %v431_v24, %v2259_v51  ;;  %v446_v33 = vrot.slane %v432_v25, %v2259_v51  ;;  %v341_v25 = vpop.f32.mrf.mxu0 }
 0x1ee   : > { %v638_v34 = vcombine.low %v613_v26, %v621_v27  ;;  %v654_v35 = vcombine.low %v629_v28, %v637_v29  ;;  %v639_v50 = vcombine.high %v613_v26, %v621_v27  ;;  %v655_v52 = vcombine.high %v629_v28, %v637_v29  ;;  %v1846_v26 = vld [vmem:[%s2187_s7 + $0x2] ss:$0 sm:$0xff] }
 0x1ef   : > { %v451_v36 = vcombine.low %v423_v30, %v430_v31  ;;  %v1847_v37 = vcombine.high %v423_v30, %v430_v31  ;;  %v467_v38 = vcombine.low %v439_v32, %v446_v33  ;;  %v1848_v39 = vcombine.high %v439_v32, %v446_v33 }
 0x1f0   : > { %v646_v40 = vrot.slane %v638_v34, %v2259_v51  ;;  %v662_v41 = vrot.slane %v654_v35, %v2259_v51  ;;  %v653_v59 = vrot.slane %v639_v50, %v2259_v51  ;;  %v669_v60 = vrot.slane %v655_v52, %v2259_v51 }
 0x1f1   : > { %v458_v42 = vrot.slane %v451_v36, %v2257_v44  ;;  %v466_v43 = vrot.slane %v1847_v37, %v2257_v44  ;;  %v474_v45 = vrot.slane %v467_v38, %v2257_v44  ;;  %v482_v46 = vrot.slane %v1848_v39, %v2257_v44 }
 0x1f2   : > { %v670_v47 = vcombine.low %v646_v40, %v662_v41  ;;  %v671_v58 = vcombine.high %v646_v40, %v662_v41  ;;  %v672_v0 = vcombine.low %v653_v59, %v669_v60  ;;  %v673_v2 = vcombine.high %v653_v59, %v669_v60 }
 0x1f3   : > { %v483_v48 = vcombine.low %v458_v42, %v466_v43  ;;  %v499_v49 = vcombine.low %v474_v45, %v482_v46  ;;  %v484_v55 = vcombine.high %v458_v42, %v466_v43  ;;  %v500_v56 = vcombine.high %v474_v45, %v482_v46 }
 0x1f4   : > { %1901 = vmatpush3.xpose.msk.msra.mxu1 %vm820_vm2, %v670_v47  ;;  %v372_v27 = vadd.f32 %v1846_v26, %v341_v25 }
 0x1f5   : > { %1905 = vmatprep.subr.mxu1 %v2087_v4  ;;  %v491_v53 = vrot.slane %v483_v48, %v2259_v51  ;;  %v507_v54 = vrot.slane %v499_v49, %v2259_v51  ;;  %v498_v62 = vrot.slane %v484_v55, %v2259_v51  ;;  %v514_v63 = vrot.slane %v500_v56, %v2259_v51 }
 0x1f7   : > { %v515_v57 = vcombine.low %v491_v53, %v507_v54  ;;  %v516_v61 = vcombine.high %v491_v53, %v507_v54  ;;  %v517_v1 = vcombine.low %v498_v62, %v514_v63  ;;  %v518_v3 = vcombine.high %v498_v62, %v514_v63 }
 0x1f9   : > { %1903 = vmatmul.mubr.msk.f32.vlgmr.msra.gmra.mxu1 %vm820_vm2, %v515_v57 }
 0x1fa   : > { %1906 = vmatpush3.xpose.msk.msra.mxu1 %vm820_vm2, %v671_v58  ;;  %1907 = vmatprep.mubr.msk.f32.mxu1 %vm2092_vm1, %v2087_v4 }
 0x1fb   : > { %1910 = vmatprep.subr.mxu1 %v2087_v4 }
 0x1fd   : > { %1908 = vmatmul.mubr.msk.f32.vlgmr.msra.gmra.mxu1 %vm820_vm2, %v516_v61 }
 0x1fe   : > { %1911 = vmatpush3.xpose.msk.msra.mxu1 %vm820_vm2, %v672_v0  ;;  %1912 = vmatprep.mubr.msk.f32.mxu1 %vm2092_vm1, %v2087_v4 }
 0x1ff   : > { %1915 = vmatprep.subr.mxu1 %v2087_v4 }
 0x201   : > { %1913 = vmatmul.mubr.msk.f32.vlgmr.msra.gmra.mxu1 %vm820_vm2, %v517_v1 }
 0x202   : > { %1916 = vmatpush3.xpose.msk.msra.mxu1 %vm820_vm2, %v673_v2  ;;  %1917 = vmatprep.mubr.msk.f32.mxu1 %vm2092_vm1, %v2087_v4 }
 0x203   : > { %1920 = vmatprep.subr.mxu1 %v2087_v4 }
 0x205   : > { %1918 = vmatmul.mubr.msk.f32.vlgmr.msra.gmra.mxu1 %vm820_vm2, %v518_v3 }
 0x206   : > { %1922 = vmatprep.mubr.msk.f32.mxu1 %vm2092_vm1, %v2087_v4 }
 0x2b9   : > { %v893_v5 = vpop.f32.mrf.mxu1 }
 0x2ba   : > { %v1126_v7 = vsel %vm1125_vm3, %v893_v5, -inf }
 0x2bb   : > { %1127 = vmax.xlane.f32.xlu1 %v1126_v7  ;;  %v1904_v9 = vpop.f32.mrf.mxu1 }
 0x2bd   : > { %v969_v11 = vpop.f32.mrf.mxu1 }
 0x2be   : > { %v1129_v13 = vsel %vm1125_vm3, %v969_v11, -inf }
 0x2bf   : > { %1130 = vmax.xlane.f32.xlu0 %v1129_v13  ;;  %v1909_v15 = vpop.f32.mrf.mxu1 }
 0x2c1   : > { %v1045_v17 = vpop.f32.mrf.mxu1 }
 0x2c2   : > { %v1132_v19 = vsel %vm1125_vm3, %v1045_v17, -inf }
 0x2c3   : > { %1133 = vmax.xlane.f32.xlu0 %v1132_v19  ;;  %v1914_v21 = vpop.f32.mrf.mxu1 }
 0x2c5   : > { %v1121_v22 = vpop.f32.mrf.mxu1 }
 0x2c6   : > { %v1135_v23 = vsel %vm1125_vm3, %v1121_v22, -inf }
 0x2c7   : > { %1136 = vmax.xlane.f32.xlu1 %v1135_v23  ;;  %v1919_v24 = vpop.f32.mrf.mxu1 }
 0x2d8   : > { %675 = vrot.lane.b32.xlu1 %v372_v27, %s2090_s26 }
 0x344   : > { %v1128_v28 = vpop.xlane.xlu1 %1127 }
 0x345   : > { %v1138_v29 = vsub.f32 %v893_v5, %v1128_v28 }
 0x347   : > { %v1142_v30 = vmul.f32 1.442695, %v1138_v29 }
 0x348   : > { %v1131_v31 = vpop.xlane.xlu0 %1130 }
 0x349   : > { %2009 = vpow2.f32 %v1142_v30  ;;  %v1139_v32 = vsub.f32 %v969_v11, %v1131_v31 }
 0x34b   : > { %v1144_v33 = vmul.f32 1.442695, %v1139_v32 }
 0x34c   : > { %v1134_v34 = vpop.xlane.xlu0 %1133 }
 0x34d   : > { %2011 = vpow2.f32 %v1144_v33  ;;  %v1140_v35 = vsub.f32 %v1045_v17, %v1134_v34 }
 0x34f   : > { %v1146_v36 = vmul.f32 1.442695, %v1140_v35 }
 0x350   : > { %v1137_v43 = vpop.xlane.xlu1 %1136 }
 0x351   : > { %2013 = vpow2.f32 %v1146_v36  ;;  %v1141_v45 = vsub.f32 %v1121_v22, %v1137_v43 }
 0x353   : > { %v1148_v46 = vmul.f32 1.442695, %v1141_v45 }
 0x355   : > { %2015 = vpow2.f32 %v1148_v46 }
 0x356   : > { %v2319_v37 = vpop.eup %2009 }
 0x357   : > { %v1150_v38 = vsel %vm1125_vm3, %v2319_v37, 0.0 }
 0x358   : > { %1151 = vadd.xlane.f32.xlu0 %v1150_v38 }
 0x35a   : > { %v2323_v39 = vpop.eup %2011 }
 0x35b   : > { %v1153_v40 = vsel %vm1125_vm3, %v2323_v39, 0.0 }
 0x35c   : > { %1154 = vadd.xlane.f32.xlu1 %v1153_v40 }
 0x35e   : > { %v2327_v41 = vpop.eup %2013 }
 0x35f   : > { %v1156_v42 = vsel %vm1125_vm3, %v2327_v41, 0.0 }
 0x360   : > { %1157 = vadd.xlane.f32.xlu0 %v1156_v42 }
 0x362   : > { %v2343_v47 = vpop.eup %2015 }
 0x36d   : > { %681 = vrot.lane.b32.xlu1 %v372_v27, %s2091_s27 }
 0x376   : > { %678 = vrot.lane.b32.xlu0 %v372_v27, %s2089_s25 }
 0x37a   : > { %1645 = vrot.lane.b32.xlu0 %v2197_v6, %s2088_s11  ;;  %v1159_v6 = vsel %vm1125_vm3, %v2343_v47, 0.0 }
 0x37e   : > { %1643 = vrot.lane.b32.xlu0 %v2201_v8, %s2088_s11  ;;  %v676_v8 = vpop.permute.xlu1 %675 }
 0x382   : > { %1641 = vrot.lane.b32.xlu0 %v2206_v10, %s2088_s11 }
 0x386   : > { %1639 = vrot.lane.b32.xlu0 %v2211_v12, %s2088_s11 }
 0x38a   : > { %1637 = vrot.lane.b32.xlu0 %v2216_v14, %s2088_s11 }
 0x38e   : > { %1635 = vrot.lane.b32.xlu0 %v2221_v16, %s2088_s11 }
 0x391   : > { %1160 = vadd.xlane.f32.xlu1 %v1159_v6 }
 0x392   : > { %1633 = vrot.lane.b32.xlu0 %v2227_v18, %s2088_s11 }
 0x3e1   : > { %v1152_v10 = vpop.xlane.xlu0 %1151 }
 0x3e2   : > { %2017 = vrcp.f32 %v1152_v10 }
 0x3e5   : > { %v1155_v48 = vpop.xlane.xlu1 %1154 }
 0x3e6   : > { %2019 = vrcp.f32 %v1155_v48 }
 0x3e9   : > { %v1158_v49 = vpop.xlane.xlu0 %1157  ;;  %v682_v12 = vpop.permute.xlu1 %681 }
 0x3ea   : > { %v700_v50 = vcombine.low %v676_v8, %v682_v12  ;;  %v701_v52 = vcombine.high %v676_v8, %v682_v12  ;;  %2021 = vrcp.f32 %v1158_v49 }
 0x3ec   : > { %v708_v16 = vrot.slane %v700_v50, %v2257_v44  ;;  %v715_v55 = vrot.slane %v701_v52, %v2257_v44 }
 0x3ed   : > { %v679_v14 = vpop.permute.xlu0 %678 }
 0x3ee   : > { %v684_v53 = vcombine.low %v372_v27, %v679_v14  ;;  %v685_v54 = vcombine.high %v372_v27, %v679_v14 }
 0x3ef   : > { %v2018_v19 = vpop.eup %2017 }
 0x3f0   : > { %v692_v56 = vrot.slane %v684_v53, %v2257_v44  ;;  %v699_v57 = vrot.slane %v685_v54, %v2257_v44  ;;  %v1163_v26 = vmul.f32 %v2018_v19, %v2319_v37 }
 0x3f2   : > { %v716_v18 = vcombine.low %v692_v56, %v708_v16  ;;  %v717_v58 = vcombine.high %v692_v56, %v708_v16  ;;  %v732_v59 = vcombine.low %v699_v57, %v715_v55  ;;  %v733_v60 = vcombine.high %v699_v57, %v715_v55 }
 0x3f3   : > { %v2020_v27 = vpop.eup %2019 }
 0x3f4   : > { %v724_v61 = vrot.slane %v716_v18, %v2259_v51  ;;  %v731_v62 = vrot.slane %v717_v58, %v2259_v51  ;;  %v740_v63 = vrot.slane %v732_v59, %v2259_v51  ;;  %v747_v0 = vrot.slane %v733_v60, %v2259_v51 }
 0x3f5   : > { %v1165_v31 = vmul.f32 %v2020_v27, %v2323_v39  ;;  %v1646_v39 = vpop.permute.xlu0 %1645 }
 0x3f6   : > { %v752_v1 = vcombine.low %v724_v61, %v731_v62  ;;  %v1851_v2 = vcombine.high %v724_v61, %v731_v62  ;;  %v768_v3 = vcombine.low %v740_v63, %v747_v0  ;;  %v1852_v5 = vcombine.high %v740_v63, %v747_v0  ;;  %1941 = vmatpush3.msra.mxu0 %v1646_v39 }
 0x3f7   : > { %v2022_v32 = vpop.eup %2021  ;;  %1942 = vmatprep.subr.mxu0 %v2087_v4 }
 0x3f8   : > { %v759_v7 = vrot.slane %v752_v1, %v2257_v44  ;;  %v767_v9 = vrot.slane %v1851_v2, %v2257_v44  ;;  %v775_v11 = vrot.slane %v768_v3, %v2257_v44  ;;  %v783_v13 = vrot.slane %v1852_v5, %v2257_v44 }
 0x3f9   : > { %v1167_v34 = vmul.f32 %v2022_v32, %v2327_v41  ;;  %v1644_v40 = vpop.permute.xlu0 %1643 }
 0x3fa   : > { %v784_v15 = vcombine.low %v759_v7, %v767_v9  ;;  %v800_v17 = vcombine.low %v775_v11, %v783_v13  ;;  %v785_v23 = vcombine.high %v759_v7, %v767_v9  ;;  %v801_v24 = vcombine.high %v775_v11, %v783_v13  ;;  %1943 = vmatpush3.msra.mxu0 %v1644_v40 }
 0x3fb   : > { %1944 = vmatprep.subr.mxu0 %v2087_v4 }
 0x3fc   : > { %v792_v21 = vrot.slane %v784_v15, %v2259_v51  ;;  %v808_v22 = vrot.slane %v800_v17, %v2259_v51  ;;  %v799_v29 = vrot.slane %v785_v23, %v2259_v51  ;;  %v815_v30 = vrot.slane %v801_v24, %v2259_v51 }
 0x3fd   : > { %v1642_v41 = vpop.permute.xlu0 %1641 }
 0x3fe   : > { %v816_v25 = vcombine.low %v792_v21, %v808_v22  ;;  %v817_v28 = vcombine.high %v792_v21, %v808_v22  ;;  %v818_v33 = vcombine.low %v799_v29, %v815_v30  ;;  %v819_v35 = vcombine.high %v799_v29, %v815_v30  ;;  %1945 = vmatpush3.msra.mxu0 %v1642_v41 }
 0x3ff   : > { %1946 = vmatprep.subr.mxu0 %v2087_v4 }
 0x400   : > { %1921 = vmatpush3.msra.mxu1 %v816_v25 }
 0x401   : > { %1923 = vmatmul.mubr.msk.f32.vlgmr.msra.gmra.mxu1 %vm1125_vm3, %v1163_v26  ;;  %1925 = vmatprep.subr.mxu1 %v2087_v4  ;;  %v1640_v42 = vpop.permute.xlu0 %1639 }
 0x402   : > { %1926 = vmatpush3.msra.mxu1 %v817_v28  ;;  %1927 = vmatprep.mubr.msk.f32.mxu1 %vm2092_vm1, %v2087_v4 }
 0x403   : > { %1930 = vmatprep.subr.mxu1 %v2087_v4  ;;  %1947 = vmatpush3.msra.mxu0 %v1640_v42 }
 0x404   : > { %1948 = vmatprep.subr.mxu0 %v2087_v4 }
 0x405   : > { %1928 = vmatmul.mubr.msk.f32.vlgmr.msra.gmra.mxu1 %vm1125_vm3, %v1165_v31  ;;  %v1638_v43 = vpop.permute.xlu0 %1637 }
 0x406   : > { %1931 = vmatpush3.msra.mxu1 %v818_v33  ;;  %1932 = vmatprep.mubr.msk.f32.mxu1 %vm2092_vm1, %v2087_v4 }
 0x407   : > { %1935 = vmatprep.subr.mxu1 %v2087_v4  ;;  %1949 = vmatpush3.msra.mxu0 %v1638_v43 }
 0x408   : > { %1950 = vmatprep.subr.mxu0 %v2087_v4 }
 0x409   : > { %1933 = vmatmul.mubr.msk.f32.vlgmr.msra.gmra.mxu1 %vm1125_vm3, %v1167_v34  ;;  %v1636_v45 = vpop.permute.xlu0 %1635  ;;  %v1868_v34 = vld [vmem:[%s2187_s7 + $0x3] ss:$0 sm:$0xff]  ;;  %s2029_s7 = sshll.u32 %s2098_s16, 4  ;;  %s2030_s7 = int_to_ptr.vmem [resolvable:$false] %s2029_s7 }
 0x40a   : > { %1936 = vmatpush3.msra.mxu1 %v819_v35  ;;  %1937 = vmatprep.mubr.msk.f32.mxu1 %vm2092_vm1, %v2087_v4  ;;  %s2031_s24 = scalar_lea.vmem %s2030_s7, 256  ;;  %p2032_p3 = scmp.lt.s32.totalorder %s1744_s9, %s2030_s7 }
 0x40b   : > { %1951 = vmatpush3.msra.mxu0 %v1636_v45  ;;  %p2033_p4 = scmp.lt.s32.totalorder %s2031_s24, %s2025_s20 }
 0x40c   : > { %1952 = vmatprep.subr.mxu0 %v2087_v4 }
 0x40d   : > { %v1634_v46 = vpop.permute.xlu0 %1633  ;;  %p2034_p5 = por %p2033_p4, %p2032_p3 }
 0x40e   : > { %1953 = vmatpush3.msra.mxu0 %v1634_v46 }
 0x40f   : > { %1954 = vmatprep.subr.mxu0 %v2087_v4  ;;  %p2035_p7 = pnand %p2034_p5, %p2028_p2 }
 0x41a   : > { %v1161_v36 = vpop.xlane.xlu1 %1160 }
 0x41b   : > { %2023 = vrcp.f32 %v1161_v36 }
 0x428   : > { %v2024_v37 = vpop.eup %2023 }
 0x429   : > { %v1169_v38 = vmul.f32 %v2024_v37, %v2343_v47 }
 0x42b   : > { %1938 = vmatmul.mubr.msk.f32.vlgmr.msra.gmra.mxu1 %vm1125_vm3, %v1169_v38 }
 0x4c1   : > { %v1239_v47 = vpop.f32.mrf.mxu1 }
 0x4c3   : > { %v1924_v6 = vpop.f32.mrf.mxu1 }
 0x4c5   : > { %v1312_v8 = vpop.f32.mrf.mxu1 }
 0x4c7   : > { %v1929_v10 = vpop.f32.mrf.mxu1 }
 0x4c9   : > { %v1385_v48 = vpop.f32.mrf.mxu1 }
 0x4ca   : > { %v1462_v12 = vcombine.low %v1239_v47, %v1385_v48  ;;  %v1463_v50 = vcombine.high %v1239_v47, %v1385_v48 }
 0x4cb   : > { %v1934_v49 = vpop.f32.mrf.mxu1 }
 0x4cc   : > { %v1470_v16 = vrot.slane %v1462_v12, %v2257_v44  ;;  %v1477_v55 = vrot.slane %v1463_v50, %v2257_v44 }
 0x4eb   : > { %v1458_v52 = vpop.f32.mrf.mxu1 }
 0x4ec   : > { %v1478_v14 = vcombine.low %v1312_v8, %v1458_v52  ;;  %v1479_v53 = vcombine.high %v1312_v8, %v1458_v52 }
 0x4ed   : > { %v1939_v54 = vpop.f32.mrf.mxu1 }
 0x4ee   : > { %v1486_v56 = vrot.slane %v1478_v14, %v2257_v44  ;;  %v1493_v4 = vrot.slane %v1479_v53, %v2257_v44 }
 0x4f0   : > { %v1494_v57 = vcombine.low %v1470_v16, %v1486_v56  ;;  %v1495_v18 = vcombine.high %v1470_v16, %v1486_v56  ;;  %v1510_v58 = vcombine.low %v1477_v55, %v1493_v4  ;;  %v1511_v59 = vcombine.high %v1477_v55, %v1493_v4 }
 0x4f2   : > { %v1502_v60 = vrot.slane %v1494_v57, %v2259_v51  ;;  %v1509_v61 = vrot.slane %v1495_v18, %v2259_v51  ;;  %v1518_v62 = vrot.slane %v1510_v58, %v2259_v51  ;;  %v1525_v63 = vrot.slane %v1511_v59, %v2259_v51 }
 0x4f4   : > { %v1530_v0 = vcombine.low %v1502_v60, %v1509_v61  ;;  %v1865_v1 = vcombine.high %v1502_v60, %v1509_v61  ;;  %v1546_v2 = vcombine.low %v1518_v62, %v1525_v63  ;;  %v1866_v3 = vcombine.high %v1518_v62, %v1525_v63 }
 0x4f6   : > { %v1537_v5 = vrot.slane %v1530_v0, %v2257_v44  ;;  %v1545_v7 = vrot.slane %v1865_v1, %v2257_v44  ;;  %v1553_v9 = vrot.slane %v1546_v2, %v2257_v44  ;;  %v1561_v11 = vrot.slane %v1866_v3, %v2257_v44 }
 0x4f8   : > { %v1563_v13 = vcombine.high %v1537_v5, %v1545_v7  ;;  %v1579_v15 = vcombine.high %v1553_v9, %v1561_v11  ;;  %v1562_v17 = vcombine.low %v1537_v5, %v1545_v7  ;;  %v1578_v19 = vcombine.low %v1553_v9, %v1561_v11 }
 0x4fa   : > { %v1577_v21 = vrot.slane %v1563_v13, %v2259_v51  ;;  %v1593_v22 = vrot.slane %v1579_v15, %v2259_v51  ;;  %v1570_v23 = vrot.slane %v1562_v17, %v2259_v51  ;;  %v1586_v24 = vrot.slane %v1578_v19, %v2259_v51 }
 0x4fc   : > { %v1597_v25 = vcombine.high %v1577_v21, %v1593_v22  ;;  %v1595_v26 = vcombine.high %v1570_v23, %v1586_v24  ;;  %v1594_v27 = vcombine.low %v1570_v23, %v1586_v24  ;;  %v1596_v44 = vcombine.low %v1577_v21, %v1593_v22 }
 0x4fe   : > { %1607 = vrot.lane.b32.xlu1 %v1597_v25, %s2095_s28  ;;  %1599 = vrot.lane.b32.xlu0 %v1595_v26, %s2096_s29 }
 0x502   : > { %1603 = vrot.lane.b32.xlu0 %v1596_v44, %s2097_s4 }
 0x506   : > { %1631 = vrot.lane.b32.xlu0 %v2235_v20, %s2088_s11 }
 0x570   : > { %v1600_v28 = vpop.permute.xlu0 %1599  ;;  %v1608_v31 = vpop.permute.xlu1 %1607 }
 0x571   : > { %v1610_v51 = vsel %vm820_vm2, %v1594_v27, %v1600_v28 }
 0x574   : > { %v1604_v29 = vpop.permute.xlu0 %1603 }
 0x575   : > { %v1612_v30 = vsel %vm1611_vm4, %v1610_v51, %v1604_v29 }
 0x576   : > { %v1614_v33 = vsel %vm1613_vm5, %v1612_v30, %v1608_v31 }
 0x578   : > { %v1632_v32 = vpop.permute.xlu0 %1631 }
 0x579   : > { %1955 = vmatpush3.msra.mxu0 %v1632_v32 }
 0x57a   : > { %1957 = vmatmul.mubr.msk.f32.vlgmr.msra.gmra.mxu0 %vm269_vm0, %v1614_v33 }
 0x63a   : > { %v1724_v20 = vpop.f32.mrf.mxu0 }
 0x63b   : > { %v1725_v35 = vadd.f32 %v1868_v34, %v1724_v20 }
 0x63c   : > { %v1958_v36 = vpop.f32.mrf.mxu0 }
 0x63d   : > { %1728 = vst.msk [vmem:[%s242_s8] sm:$0xff] %vm269_vm0, %v1725_v35 }
 0x63e   : > { %2038 = shalt.err (!%p2035_p7)
}
 0x63f   : > { %s2039_s25 = scalar_lea.hbm %s2417_s17, 128  ;;  %s2043_s27 = scalar_lea.hbm %s2458_s3, 256 }
 0x640   : > { %p2040_p10 = scmp.ne.s32.totalorder %s2417_s17, %s2039_s25  ;;  %p2044_p13 = scmp.lt.s32.totalorder %s2417_s17, %s2458_s3 }
 0x641   : > { %p2045_p0 = scmp.lt.s32.totalorder %s2043_s27, %s2039_s25 }
 0x642   : > { %p2041_p11 = pnand %p2040_p10, %p2158_p6 }
 0x643   : > { %p2046_p1 = por %p2045_p0, %p2044_p13 }
 0x644   : > { %p2042_p12 = pneg %p2041_p11 }
 0x646   : > { %p2047_p2 = pnand %p2046_p1, %p2042_p12 }
 0x648   : > { %2050 = shalt.err (!%p2047_p2)
}
 0x649   : > { %1959 = dma.vmem_to_hbm [thread:$0]  (%p2158_p6), %s1744_s9, 128, %s2417_s17, %s1730_s19  }
 0x64a PF: > { %s1755_s4 = sand.u32 1, %s2073_s12   ;;  %p1962_p3 = pnand %p1833_p9, %p2162_p8 }
 0x64b   : > { %s1756_s5 = scalar_lea.sflag [#allocation4], %s1755_s4 }
 0x64c   : > { %p1963_p4 = pneg %p1962_p3 }
 0x64e   : > { %2068 = dma.done.wait (%p1963_p4), %s1756_s5, 128  }
 0x64f   : > { %2070 = vsyncadd (%p1963_p4), %s1756_s5, 4294967168  ;;  %p13_p5 = scmp.ge.s32.totalorder %s2144_s18, 4   ;;  %s2461_s12 = smov %s2077_s13 }
 0x650   : > { %s2462_s13 = smov %s2081_s14  ;;  %s2463_s14 = smov %s2156_s21 }
 0x651   : > { %s2464_s15 = smov %s2144_s18  ;;  %15 = sbr.rel (!%p13_p5) target bundleno = 3 (0x3), region = 115 }
 0x656   :  { %1761 = vsyncpa [#allocation4], 1 }
 0x657   :  { %1763 = vsyncpa [#allocation4 + $0x1], 1 }

</bundles_post_ra>
